<compile_context>
chip_gen: v6e
topology: v6e:2x2x1
jax: 0.10.0
libtpu: 0.0.40
codegen_flags: <defaults>
</compile_context>

<pallas_src>
import jax
import jax.numpy as jnp
from jax.experimental import pallas as pl
from jax.experimental.pallas import tpu as pltpu

IN_DIM = 784
HID_DIM = 128

DEFAULT_BATCH_TILE = 1024     # target rows per grid step (multiple of 8)
_MIN_SPLIT_ROWS = 512         # batches >= this get >= 2 grid steps (v7x 2 TCs)
_STEP_OVERHEAD_ROWS = 160     # ~0.35 us fixed per-step cost, in row-equivalents
_VMEM_LIMIT_BYTES = 32 * 1024 * 1024   # fits physical VMEM on v5e/v6e/v7x


def _round_up(n, m):
    return ((n + m - 1) // m) * m


def _choose_tiling(batch, target):
    """Pick (batch_tile, padded_batch).

    * Pads only to a multiple of 8 (plus at most a few rows), never blindly to
      a multiple of the tile.
    * Uses a simple cost model (per-step overhead + padded-row traffic) to pick
      the tile size.
    * For batches >= _MIN_SPLIT_ROWS the tile is capped at half the batch so
      the grid has >= 2 steps and both v7x TensorCores get work.
    """
    target = max(8, (int(target) // 8) * 8)
    bp8 = _round_up(max(int(batch), 1), 8)

    # Tiny batch: a single tile, padded only to a multiple of 8.
    if bp8 < _MIN_SPLIT_ROWS and bp8 <= target:
        return bp8, bp8

    max_bt = min(target, bp8 // 2 if bp8 >= _MIN_SPLIT_ROWS else bp8)
    max_bt = max(8, (max_bt // 8) * 8)

    best = None
    for bt in range(8, max_bt + 1, 8):
        bp = _round_up(bp8, bt)
        steps = bp // bt
        cost = steps * _STEP_OVERHEAD_ROWS + (bp - batch)
        if best is None or cost < best[0]:
            best = (cost, bt, bp)
    return best[1], best[2]


def _autoencoder_kernel(x_ref,
                        w1_ref, b1_ref,
                        w2_ref, b2_ref,
                        w3_ref, b3_ref,
                        w4_ref, b4_ref,
                        out_ref):
    """Full forward pass for one batch tile; all four matmuls on the MXU.

    x arrives at its native dtype (f32) and is cast to the weights' compute
    dtype inside the kernel (the VPU cast hides under the tile DMA).  All
    matmuls accumulate in f32; bias-add + ReLU happen in f32; activations are
    cast back to the compute dtype between layers so every matmul feeds the
    MXU at the narrow width.
    """
    cdt = w1_ref.dtype
    x = x_ref[...].astype(cdt)                               # (BT, 784)

    # encoder_in + ReLU
    h = jnp.dot(x, w1_ref[...], preferred_element_type=jnp.float32)
    h = jnp.maximum(h + b1_ref[...], 0.0).astype(cdt)        # (BT, 128)

    # encoder_hidden + ReLU  -> code
    h = jnp.dot(h, w2_ref[...], preferred_element_type=jnp.float32)
    h = jnp.maximum(h + b2_ref[...], 0.0).astype(cdt)        # (BT, 128)

    # decoder_hidden + ReLU
    h = jnp.dot(h, w3_ref[...], preferred_element_type=jnp.float32)
    h = jnp.maximum(h + b3_ref[...], 0.0).astype(cdt)        # (BT, 128)

    # decoder_out + ReLU
    y = jnp.dot(h, w4_ref[...], preferred_element_type=jnp.float32)
    y = jnp.maximum(y + b4_ref[...], 0.0)                    # (BT, 784) f32

    out_ref[...] = y.astype(out_ref.dtype)


def autoencoder_forward(x, params, *,
                        batch_tile=DEFAULT_BATCH_TILE,
                        compute_dtype=jnp.bfloat16,
                        out_dtype=jnp.bfloat16):
    """x: (B, 784).  params: dict of weights/biases (see init_params).

    For best performance pass params through prepare_params() once (weights
    pre-cast to `compute_dtype`) and keep out_dtype at bf16 unless the caller
    needs f32-exact downstream math.
    """
    B, D = x.shape
    assert D == IN_DIM

    bt, Bp = _choose_tiling(B, batch_tile)
    if Bp != B:
        # Only pads to a multiple of 8 (plus at most a few rows); padded rows
        # are sliced off below.
        x = jnp.pad(x, ((0, Bp - B), (0, 0)))

    # No-ops if prepare_params() was used (weights already compute_dtype).
    w = [params[f"w{i}"].astype(compute_dtype) for i in range(1, 5)]
    b = [params[f"b{i}"].astype(jnp.float32) for i in range(1, 5)]

    grid = (Bp // bt,)

    # Weights/biases have a constant index_map -> never re-fetched; single
    # buffer them to save VMEM.
    def const_spec(shape):
        return pl.BlockSpec(shape, lambda i, _s=shape: (0,) * len(_s),
                            pipeline_mode=pl.Buffered(1))

    flops = 2 * Bp * (IN_DIM * HID_DIM + HID_DIM * HID_DIM
                      + HID_DIM * HID_DIM + HID_DIM * IN_DIM)
    w_bytes = sum(int(wi.size) * int(wi.dtype.itemsize) for wi in w)
    b_bytes = sum(int(bi.size) * int(bi.dtype.itemsize) for bi in b)
    bytes_accessed = (int(Bp) * IN_DIM
                      * (int(x.dtype.itemsize) + int(jnp.dtype(out_dtype).itemsize))
                      + w_bytes + b_bytes)

    out = pl.pallas_call(
        _autoencoder_kernel,
        out_shape=jax.ShapeDtypeStruct((Bp, IN_DIM), out_dtype),
        grid_spec=pltpu.PrefetchScalarGridSpec(
            num_scalar_prefetch=0,
            grid=grid,
            in_specs=[
                pl.BlockSpec((bt, IN_DIM), lambda i: (i, 0)),   # x tile (native dtype)
                const_spec(w[0].shape), const_spec(b[0].shape),
                const_spec(w[1].shape), const_spec(b[1].shape),
                const_spec(w[2].shape), const_spec(b[2].shape),
                const_spec(w[3].shape), const_spec(b[3].shape),
            ],
            out_specs=pl.BlockSpec((bt, IN_DIM), lambda i: (i, 0)),
        ),
        compiler_params=pltpu.CompilerParams(
            dimension_semantics=("parallel",),       # batch tiles across TCs
            vmem_limit_bytes=_VMEM_LIMIT_BYTES,      # v5e default (16 MiB) is too small for 1024-row tiles
        ),
        cost_estimate=pl.CostEstimate(
            flops=int(flops), transcendentals=0,
            bytes_accessed=int(bytes_accessed)),
    )(x, w[0], b[0], w[1], b[1], w[2], b[2], w[3], b[3])

    return out[:B] if Bp != B else out


def init_params(key):
    """Parameter init mirroring nn.Linear defaults (U(-1/sqrt(in), 1/sqrt(in))).

    Weights are stored transposed relative to nn.Linear.weight:
      w: (in_features, out_features), b: (1, out_features)
    """
    dims = [(IN_DIM, HID_DIM), (HID_DIM, HID_DIM),
            (HID_DIM, HID_DIM), (HID_DIM, IN_DIM)]
    params = {}
    keys = jax.random.split(key, 2 * len(dims))
    for idx, (fan_in, fan_out) in enumerate(dims):
        kw, kb = keys[2 * idx], keys[2 * idx + 1]
        bound = 1.0 / jnp.sqrt(jnp.float32(fan_in))
        params[f"w{idx + 1}"] = jax.random.uniform(
            kw, (fan_in, fan_out), jnp.float32, -bound, bound)
        params[f"b{idx + 1}"] = jax.random.uniform(
            kb, (1, fan_out), jnp.float32, -bound, bound)
    return params


def prepare_params(params, compute_dtype=jnp.bfloat16):
    """One-time cast of weights to the compute dtype (biases stay f32).

    Doing this outside the per-call / jit path removes the repeated f32->bf16
    weight converts (~2.7 MB of extra HBM traffic per call).
    """
    prepped = {}
    for i in range(1, 5):
        prepped[f"w{i}"] = jnp.asarray(params[f"w{i}"], compute_dtype)
        prepped[f"b{i}"] = jnp.asarray(params[f"b{i}"], jnp.float32)
    return prepped


def _reference_forward(x, params, compute_dtype=jnp.bfloat16):
    """Pure-JAX reference with the same precision recipe as the kernel.

    Note: this bounds error vs. the bf16-compute recipe, not vs. a pure-f32
    PyTorch module; callers needing f32-exact math should pass
    compute_dtype=jnp.float32 / out_dtype=jnp.float32 to the kernel.
    """
    h = x.astype(compute_dtype)
    for i in range(1, 5):
        w = params[f"w{i}"].astype(compute_dtype)
        b = params[f"b{i}"].astype(jnp.float32)
        h = jnp.dot(h, w, preferred_element_type=jnp.float32)
        h = jnp.maximum(h + b, 0.0)
        if i < 4:
            h = h.astype(compute_dtype)
    return h


if __name__ == "__main__":
    key = jax.random.PRNGKey(0)
    k_params, k_x = jax.random.split(key)

    params = init_params(k_params)
    prepped = prepare_params(params)           # weights -> bf16, once

    # Small deterministic batch; intentionally NOT a multiple of 8 to exercise
    # the pad-and-slice path.
    B = 50
    x = jax.random.normal(k_x, (B, IN_DIM), jnp.float32)

    ref = _reference_forward(x, params)

    # f32-output path (tight check against the reference recipe).
    out_f32 = autoencoder_forward(x, prepped, out_dtype=jnp.float32)
    out_f32 = jax.block_until_ready(out_f32)
    assert out_f32.shape == (B, IN_DIM)
    assert bool(jnp.allclose(out_f32, ref, atol=2e-3, rtol=2e-3)), (
        float(jnp.max(jnp.abs(out_f32 - ref))))

    # Default (bf16-output) path: looser tolerance for the final rounding.
    out_bf16 = autoencoder_forward(x, prepped)
    out_bf16 = jax.block_until_ready(out_bf16)
    assert out_bf16.shape == (B, IN_DIM)
    assert out_bf16.dtype == jnp.bfloat16
    assert bool(jnp.allclose(out_bf16.astype(jnp.float32), ref,
                             atol=3e-2, rtol=3e-2)), (
        float(jnp.max(jnp.abs(out_bf16.astype(jnp.float32) - ref))))

    print("KERNEL_OK")
</pallas_src>

<mosaic_0001>
module attributes {stable_mosaic.version = 11 : i64} {
  func.func @_autoencoder_kernel(%arg0: i32, %arg1: memref<56x784xf32, #tpu.memory_space<vmem>>, %arg2: memref<784x128xbf16, #tpu.memory_space<vmem>>, %arg3: memref<1x128xf32, #tpu.memory_space<vmem>>, %arg4: memref<128x128xbf16, #tpu.memory_space<vmem>>, %arg5: memref<1x128xf32, #tpu.memory_space<vmem>>, %arg6: memref<128x128xbf16, #tpu.memory_space<vmem>>, %arg7: memref<1x128xf32, #tpu.memory_space<vmem>>, %arg8: memref<128x784xbf16, #tpu.memory_space<vmem>>, %arg9: memref<1x784xf32, #tpu.memory_space<vmem>>, %arg10: memref<56x784xf32, #tpu.memory_space<vmem>>) attributes {dimension_semantics = [#tpu.dimension_semantics<parallel>], iteration_bounds = array<i64: 1>, scalar_prefetch = 0 : i64, scratch_operands = 0 : i64, tpu.core_type = #tpu.core_type<tc>, window_params = [{transform_indices = @transform_0, window_bounds = array<i64: 56, 784>}, {pipeline_mode = #tpu.pipeline_mode<synchronous>, transform_indices = @transform_1, window_bounds = array<i64: 784, 128>}, {pipeline_mode = #tpu.pipeline_mode<synchronous>, transform_indices = @transform_2, window_bounds = array<i64: 1, 128>}, {pipeline_mode = #tpu.pipeline_mode<synchronous>, transform_indices = @transform_3, window_bounds = array<i64: 128, 128>}, {pipeline_mode = #tpu.pipeline_mode<synchronous>, transform_indices = @transform_4, window_bounds = array<i64: 1, 128>}, {pipeline_mode = #tpu.pipeline_mode<synchronous>, transform_indices = @transform_5, window_bounds = array<i64: 128, 128>}, {pipeline_mode = #tpu.pipeline_mode<synchronous>, transform_indices = @transform_6, window_bounds = array<i64: 1, 128>}, {pipeline_mode = #tpu.pipeline_mode<synchronous>, transform_indices = @transform_7, window_bounds = array<i64: 128, 784>}, {pipeline_mode = #tpu.pipeline_mode<synchronous>, transform_indices = @transform_8, window_bounds = array<i64: 1, 784>}, {transform_indices = @transform_9, window_bounds = array<i64: 56, 784>}]} {
    %c0 = arith.constant 0 : index
    %c0_0 = arith.constant 0 : index
    %0 = vector.load %arg1[%c0, %c0_0] : memref<56x784xf32, #tpu.memory_space<vmem>>, vector<56x784xf32>
    %1 = arith.truncf %0 : vector<56x784xf32> to vector<56x784xbf16>
    %c0_1 = arith.constant 0 : index
    %c0_2 = arith.constant 0 : index
    %2 = vector.load %arg2[%c0_1, %c0_2] : memref<784x128xbf16, #tpu.memory_space<vmem>>, vector<784x128xbf16>
    %cst = arith.constant dense<0.000000e+00> : vector<56x128xf32>
    %3 = tpu.matmul %1, %2, %cst {dimension_numbers = #tpu.dot_dimension_numbers<[1], [0], [0], [1], [0, 0, 1, 1], [], []>} : vector<56x784xbf16>, vector<784x128xbf16>, vector<56x128xf32> -> vector<56x128xf32>
    %c0_3 = arith.constant 0 : index
    %c0_4 = arith.constant 0 : index
    %4 = vector.load %arg3[%c0_3, %c0_4] : memref<1x128xf32, #tpu.memory_space<vmem>>, vector<1x128xf32>
    %5 = vector.broadcast %4 : vector<1x128xf32> to vector<56x128xf32>
    %6 = arith.addf %3, %5 : vector<56x128xf32>
    %cst_5 = arith.constant 0.000000e+00 : f32
    %7 = vector.broadcast %cst_5 : f32 to vector<56x128xf32>
    %8 = arith.maximumf %6, %7 : vector<56x128xf32>
    %9 = arith.truncf %8 : vector<56x128xf32> to vector<56x128xbf16>
    %c0_6 = arith.constant 0 : index
    %c0_7 = arith.constant 0 : index
    %10 = vector.load %arg4[%c0_6, %c0_7] : memref<128x128xbf16, #tpu.memory_space<vmem>>, vector<128x128xbf16>
    %cst_8 = arith.constant dense<0.000000e+00> : vector<56x128xf32>
    %11 = tpu.matmul %9, %10, %cst_8 {dimension_numbers = #tpu.dot_dimension_numbers<[1], [0], [0], [1], [0, 0, 1, 1], [], []>} : vector<56x128xbf16>, vector<128x128xbf16>, vector<56x128xf32> -> vector<56x128xf32>
    %c0_9 = arith.constant 0 : index
    %c0_10 = arith.constant 0 : index
    %12 = vector.load %arg5[%c0_9, %c0_10] : memref<1x128xf32, #tpu.memory_space<vmem>>, vector<1x128xf32>
    %13 = vector.broadcast %12 : vector<1x128xf32> to vector<56x128xf32>
    %14 = arith.addf %11, %13 : vector<56x128xf32>
    %cst_11 = arith.constant 0.000000e+00 : f32
    %15 = vector.broadcast %cst_11 : f32 to vector<56x128xf32>
    %16 = arith.maximumf %14, %15 : vector<56x128xf32>
    %17 = arith.truncf %16 : vector<56x128xf32> to vector<56x128xbf16>
    %c0_12 = arith.constant 0 : index
    %c0_13 = arith.constant 0 : index
    %18 = vector.load %arg6[%c0_12, %c0_13] : memref<128x128xbf16, #tpu.memory_space<vmem>>, vector<128x128xbf16>
    %cst_14 = arith.constant dense<0.000000e+00> : vector<56x128xf32>
    %19 = tpu.matmul %17, %18, %cst_14 {dimension_numbers = #tpu.dot_dimension_numbers<[1], [0], [0], [1], [0, 0, 1, 1], [], []>} : vector<56x128xbf16>, vector<128x128xbf16>, vector<56x128xf32> -> vector<56x128xf32>
    %c0_15 = arith.constant 0 : index
    %c0_16 = arith.constant 0 : index
    %20 = vector.load %arg7[%c0_15, %c0_16] : memref<1x128xf32, #tpu.memory_space<vmem>>, vector<1x128xf32>
    %21 = vector.broadcast %20 : vector<1x128xf32> to vector<56x128xf32>
    %22 = arith.addf %19, %21 : vector<56x128xf32>
    %cst_17 = arith.constant 0.000000e+00 : f32
    %23 = vector.broadcast %cst_17 : f32 to vector<56x128xf32>
    %24 = arith.maximumf %22, %23 : vector<56x128xf32>
    %25 = arith.truncf %24 : vector<56x128xf32> to vector<56x128xbf16>
    %c0_18 = arith.constant 0 : index
    %c0_19 = arith.constant 0 : index
    %26 = vector.load %arg8[%c0_18, %c0_19] : memref<128x784xbf16, #tpu.memory_space<vmem>>, vector<128x784xbf16>
    %cst_20 = arith.constant dense<0.000000e+00> : vector<56x784xf32>
    %27 = tpu.matmul %25, %26, %cst_20 {dimension_numbers = #tpu.dot_dimension_numbers<[1], [0], [0], [1], [0, 0, 1, 1], [], []>} : vector<56x128xbf16>, vector<128x784xbf16>, vector<56x784xf32> -> vector<56x784xf32>
    %c0_21 = arith.constant 0 : index
    %c0_22 = arith.constant 0 : index
    %28 = vector.load %arg9[%c0_21, %c0_22] : memref<1x784xf32, #tpu.memory_space<vmem>>, vector<1x784xf32>
    %29 = vector.broadcast %28 : vector<1x784xf32> to vector<56x784xf32>
    %30 = arith.addf %27, %29 : vector<56x784xf32>
    %cst_23 = arith.constant 0.000000e+00 : f32
    %31 = vector.broadcast %cst_23 : f32 to vector<56x784xf32>
    %32 = arith.maximumf %30, %31 : vector<56x784xf32>
    %c0_24 = arith.constant 0 : index
    %c0_25 = arith.constant 0 : index
    %33 = vector.load %arg10[%c0_24, %c0_25] : memref<56x784xf32, #tpu.memory_space<vmem>>, vector<56x784xf32>
    tpu.vector_store %arg10[%c0_24, %c0_25], %32 {strides = array<i32>} : memref<56x784xf32, #tpu.memory_space<vmem>>, vector<56x784xf32>,
    return
  }
  func.func @transform_0(%arg0: i32) -> (i32, i32) {
    %c0_i32 = arith.constant 0 : i32
    %c0_i32_0 = arith.constant 0 : i32
    return %arg0, %c0_i32 : i32, i32
  }
  func.func @transform_1(%arg0: i32) -> (i32, i32) {
    %c0_i32 = arith.constant 0 : i32
    %c0_i32_0 = arith.constant 0 : i32
    %c0_i32_1 = arith.constant 0 : i32
    return %c0_i32, %c0_i32_0 : i32, i32
  }
  func.func @transform_2(%arg0: i32) -> (i32, i32) {
    %c0_i32 = arith.constant 0 : i32
    %c0_i32_0 = arith.constant 0 : i32
    %c0_i32_1 = arith.constant 0 : i32
    return %c0_i32, %c0_i32_0 : i32, i32
  }
  func.func @transform_3(%arg0: i32) -> (i32, i32) {
    %c0_i32 = arith.constant 0 : i32
    %c0_i32_0 = arith.constant 0 : i32
    %c0_i32_1 = arith.constant 0 : i32
    return %c0_i32, %c0_i32_0 : i32, i32
  }
  func.func @transform_4(%arg0: i32) -> (i32, i32) {
    %c0_i32 = arith.constant 0 : i32
    %c0_i32_0 = arith.constant 0 : i32
    %c0_i32_1 = arith.constant 0 : i32
    return %c0_i32, %c0_i32_0 : i32, i32
  }
  func.func @transform_5(%arg0: i32) -> (i32, i32) {
    %c0_i32 = arith.constant 0 : i32
    %c0_i32_0 = arith.constant 0 : i32
    %c0_i32_1 = arith.constant 0 : i32
    return %c0_i32, %c0_i32_0 : i32, i32
  }
  func.func @transform_6(%arg0: i32) -> (i32, i32) {
    %c0_i32 = arith.constant 0 : i32
    %c0_i32_0 = arith.constant 0 : i32
    %c0_i32_1 = arith.constant 0 : i32
    return %c0_i32, %c0_i32_0 : i32, i32
  }
  func.func @transform_7(%arg0: i32) -> (i32, i32) {
    %c0_i32 = arith.constant 0 : i32
    %c0_i32_0 = arith.constant 0 : i32
    %c0_i32_1 = arith.constant 0 : i32
    return %c0_i32, %c0_i32_0 : i32, i32
  }
  func.func @transform_8(%arg0: i32) -> (i32, i32) {
    %c0_i32 = arith.constant 0 : i32
    %c0_i32_0 = arith.constant 0 : i32
    %c0_i32_1 = arith.constant 0 : i32
    return %c0_i32, %c0_i32_0 : i32, i32
  }
  func.func @transform_9(%arg0: i32) -> (i32, i32) {
    %c0_i32 = arith.constant 0 : i32
    %c0_i32_0 = arith.constant 0 : i32
    return %arg0, %c0_i32 : i32, i32
  }
}

</mosaic_0001>

<bundles_post_ra>
// kernel: tpu_custom_call.1
= control target key start
LH: loop header
LB: loop body
LE: loop exit
PB: predicated region body
PF: predicated region fallthrough
CT: control target
= control target key end

     0   :  { %14 = vsyncpa [#allocation3], 0  ;;  %s3240_s0 = inlined_call_operand.vmem [shape: f32[56,784], index: 0, kind: input, shape index: {}]   ;;  %s3241_s1 = inlined_call_operand.vmem [shape: bf16[784,128], index: 1, kind: input, shape index: {}]   ;;  %s3242_s2 = inlined_call_operand.vmem [shape: f32[1,128], index: 2, kind: input, shape index: {}]   ;;  %s3243_s3 = inlined_call_operand.hbm [shape: bf16[128,128], index: 3, kind: input, shape index: {}]   ;;  %s3244_s4 = inlined_call_operand.hbm [shape: f32[1,128], index: 4, kind: input, shape index: {}]   ;;  %s3245_s5 = inlined_call_operand.vmem [shape: bf16[128,128], index: 5, kind: input, shape index: {}]   ;;  %s3246_s6 = inlined_call_operand.hbm [shape: f32[1,128], index: 6, kind: input, shape index: {}]   ;;  %s3247_s7 = inlined_call_operand.vmem [shape: bf16[128,784], index: 7, kind: input, shape index: {}]   ;;  %s3248_s8 = inlined_call_operand.hbm [shape: f32[1,784], index: 8, kind: input, shape index: {}]   ;;  %s3249_s9 = inlined_call_operand.hbm [shape: f32[56,784], index: 9, kind: output, shape index: {}]  }
   0x1   :  { %15 = vsyncpa [#allocation6], 0 }
   0x2   :  { %16 = vsyncpa [#allocation9], 0 }
   0x3   :  { %17 = vsyncpa [#allocation4], 0  ;;  %s2548_s30 = smov [#allocation5]   ;;  %s2549_s11 = smov [#allocation2]  }
   0x4   :  { %s42_s10 = sshll.u32 %s2548_s30, 4  ;;  %s29_s12 = sshll.u32 %s2549_s11, 4  ;;  %s43_s10 = int_to_ptr.vmem [resolvable:$true] %s42_s10  ;;  %s30_s12 = int_to_ptr.vmem [resolvable:$true] %s29_s12 }
   0x5   :  { %s2448_s13 = scalar_lea.vmem %s43_s10, 16  ;;  %s2452_s14 = scalar_lea.vmem %s43_s10, 32 }
   0x6   :  { %p2449_p0 = scmp.ne.s32.totalorder %s43_s10, %s2448_s13  ;;  %p2453_p1 = scmp.lt.s32.totalorder %s43_s10, %s43_s10 }
   0x7   :  { %p2454_p2 = scmp.lt.s32.totalorder %s2452_s14, %s2448_s13 }
   0x9   :  { %p2455_p3 = por %p2454_p2, %p2453_p1 }
   0xb   :  { %p2456_p4 = pnand %p2455_p3, %p2449_p0 }
   0xd   :  { %2459 = shalt.err (!%p2456_p4)
}
   0xe   :  { %45 = dma.hbm_to_vmem [thread:$0]  %s3244_s4, 16, %s43_s10, [#allocation6]  }
   0xf   :  { %s2468_s17 = scalar_lea.vmem %s30_s12, 1024  ;;  %p2473_p6 = scmp.lt.s32.totalorder %s30_s12, %s30_s12 }
  0x10   :  { %p2469_p5 = scmp.ne.s32.totalorder %s30_s12, %s2468_s17  ;;  %p2474_p7 = scmp.lt.s32.totalorder %s2468_s17, %s2468_s17 }
  0x12   :  { %p2475_p8 = por %p2474_p7, %p2473_p6 }
  0x14   :  { %p2476_p9 = pnand %p2475_p8, %p2469_p5 }
  0x16   :  { %2479 = shalt.err (!%p2476_p9)
}
  0x17   :  { %s2550_s18 = smov 64   ;;  %s2551_s19 = smov 4  }
  0x18   :  { %35 = dma.hbm_to_vmem [thread:$0]  %s3243_s3, 1024, %s30_s12, [#allocation3], %s2550_s18, %s2550_s18, %s2551_s19  }
  0x19   :  { %s2552_s22 = smov [#allocation7]   ;;  %s2553_s24 = smov [#allocation8]  }
  0x1a   :  { %s54_s23 = sshll.u32 %s2552_s22, 4  ;;  %s66_s25 = sshll.u32 %s2553_s24, 4  ;;  %s55_s23 = int_to_ptr.vmem [resolvable:$true] %s54_s23  ;;  %s67_s25 = int_to_ptr.vmem [resolvable:$true] %s66_s25 }
  0x1b   :  { %s2488_s4 = scalar_lea.vmem %s55_s23, 16  ;;  %s2492_s26 = scalar_lea.vmem %s55_s23, 32 }
  0x1c   :  { %p2489_p10 = scmp.ne.s32.totalorder %s55_s23, %s2488_s4  ;;  %p2493_p11 = scmp.lt.s32.totalorder %s55_s23, %s55_s23 }
  0x1d   :  { %p2494_p12 = scmp.lt.s32.totalorder %s2492_s26, %s2488_s4 }
  0x1f   :  { %p2495_p13 = por %p2494_p12, %p2493_p11 }
  0x21   :  { %p2496_p0 = pnand %p2495_p13, %p2489_p10 }
  0x23   :  { %2499 = shalt.err (!%p2496_p0)
}
  0x24   :  { %57 = dma.hbm_to_vmem [thread:$0]  %s3246_s6, 16, %s55_s23, [#allocation6]  }
  0x25   :  { %s2508_s29 = scalar_lea.vmem %s67_s25, 112  ;;  %s2512_s3 = scalar_lea.vmem %s67_s25, 128 }
  0x26   :  { %p2509_p1 = scmp.ne.s32.totalorder %s67_s25, %s2508_s29  ;;  %p2513_p2 = scmp.lt.s32.totalorder %s67_s25, %s67_s25 }
  0x27   :  { %p2514_p3 = scmp.lt.s32.totalorder %s2512_s3, %s2508_s29 }
  0x29   :  { %p2515_p4 = por %p2514_p3, %p2513_p2 }
  0x2b   :  { %p2516_p5 = pnand %p2515_p4, %p2509_p1 }
  0x2d   :  { %2519 = shalt.err (!%p2516_p5)
}
  0x2e   :  { %69 = dma.hbm_to_vmem [thread:$0]  %s3248_s8, 112, %s67_s25, [#allocation9]  }
  0x2f   :  { %2540 = dma.done.wait [#allocation3], 1024  }
  0x30   :  { %2541 = vsyncadd [#allocation3], 4294966272 }
  0x31   :  { %2542 = dma.done.wait [#allocation6], 32  }
  0x32   :  { %2543 = vsyncadd [#allocation6], 4294967264 }
  0x33   :  { %2544 = dma.done.wait [#allocation9], 112  }
  0x34   :  { %2545 = vsyncadd [#allocation9], 4294967184  ;;  %v2295_v0 = vld [vmem:[%s3241_s1 + $0x78] sm:$0xff]   ;;  %v2299_v4 = vld [vmem:[%s3241_s1 + $0x70] sm:$0xff]   ;;  %vm559_vm0 = vcmask 130048  }
  0x35   :  { %v2296_v1 = vld [vmem:[%s3241_s1 + $0x38] sm:$0xff]   ;;  %2042 = vmatprep.subr.bf16.mxu0 %v2295_v0  ;;  %v2300_v5 = vld [vmem:[%s3241_s1 + $0x30] sm:$0xff]   ;;  %v2303_v8 = vld [vmem:[%s3241_s1 + $0x68] sm:$0xff]  }
  0x36   :  { %v2297_v2 = vld [vmem:[%s3241_s1 + $0xf8] sm:$0xff]   ;;  %2043 = vmatpush3.bf16.msra.mxu0 %v2296_v1  ;;  %v2301_v6 = vld [vmem:[%s3241_s1 + $0xf0] sm:$0xff]   ;;  %v2304_v9 = vld [vmem:[%s3241_s1 + $0x28] sm:$0xff]  }
  0x37   :  { %v2298_v3 = vld [vmem:[%s3241_s1 + $0xb8] sm:$0xff]   ;;  %2082 = vmatprep.subr.bf16.mxu1 %v2297_v2  ;;  %2044 = vmatprep.subr.bf16.mxu0 %v2299_v4  ;;  %v2302_v7 = vld [vmem:[%s3241_s1 + $0xb0] sm:$0xff]   ;;  %v2305_v10 = vld [vmem:[%s3241_s1 + $0xe8] sm:$0xff]  }
  0x38   :  { %2083 = vmatpush3.bf16.msra.mxu1 %v2298_v3  ;;  %v2306_v11 = vld [vmem:[%s3241_s1 + $0xa8] sm:$0xff]   ;;  %v2307_v12 = vld [vmem:[%s3241_s1 + $0x60] sm:$0xff]   ;;  %v2311_v16 = vld [vmem:[%s3241_s1 + $0x58] sm:$0xff]  }
  0x39   :  { %2084 = vmatprep.subr.bf16.mxu1 %v2301_v6  ;;  %v2308_v13 = vld [vmem:[%s3241_s1 + $0x20] sm:$0xff]   ;;  %v2312_v17 = vld [vmem:[%s3241_s1 + $0x18] sm:$0xff]   ;;  %v2315_v20 = vld [vmem:[%s3241_s1 + $0x50] sm:$0xff]  }
  0x3a   :  { %2045 = vmatpush3.bf16.msra.mxu0 %v2300_v5  ;;  %v2309_v14 = vld [vmem:[%s3241_s1 + $0xe0] sm:$0xff]   ;;  %v2313_v18 = vld [vmem:[%s3241_s1 + $0xd8] sm:$0xff]   ;;  %v2316_v21 = vld [vmem:[%s3241_s1 + $0x10] sm:$0xff]  }
  0x3b   :  { %2046 = vmatprep.subr.bf16.mxu0 %v2303_v8  ;;  %v2310_v15 = vld [vmem:[%s3241_s1 + $0xa0] sm:$0xff]   ;;  %v2314_v19 = vld [vmem:[%s3241_s1 + $0x98] sm:$0xff]   ;;  %v2317_v22 = vld [vmem:[%s3241_s1 + $0xd0] sm:$0xff]  }
  0x3c   :  { %2085 = vmatpush3.bf16.msra.mxu1 %v2302_v7  ;;  %v2318_v23 = vld [vmem:[%s3241_s1 + $0x90] sm:$0xff]   ;;  %v2319_v24 = vld [vmem:[%s3241_s1 + $0x48] sm:$0xff]   ;;  %v2323_v28 = vld [vmem:[%s3241_s1 + $0x40] sm:$0xff]  }
  0x3d   :  { %2086 = vmatprep.subr.bf16.mxu1 %v2305_v10  ;;  %v2320_v25 = vld [vmem:[%s3241_s1 + $0x8] sm:$0xff]   ;;  %v2324_v29 = vld [vmem:[%s3241_s1] sm:$0xff]   ;;  %v90_v36 = vld [vmem:[%s3240_s0 + $0x38] sm:$0xff] }
  0x3e   :  { %2047 = vmatpush3.bf16.msra.mxu0 %v2304_v9  ;;  %v2321_v26 = vld [vmem:[%s3241_s1 + $0xc8] sm:$0xff]   ;;  %v2325_v30 = vld [vmem:[%s3241_s1 + $0xc0] sm:$0xff]   ;;  %v2327_v38 = vld [vmem:[%s3241_s1 + $0x178] sm:$0xff]  }
  0x3f   :  { %2048 = vmatprep.subr.bf16.mxu0 %v2307_v12  ;;  %v2322_v27 = vld [vmem:[%s3241_s1 + $0x88] sm:$0xff]   ;;  %v91_v32 = vld [vmem:[%s3240_s0 + $0x40] sm:$0xff]  ;;  %v86_v39 = vld [vmem:[%s3240_s0 + $0x18] sm:$0xff] }
  0x40   :  { %2087 = vmatpush3.bf16.msra.mxu1 %v2306_v11  ;;  %v84_v31 = vld [vmem:[%s3240_s0 + $0x8] sm:$0xff]  ;;  %v2326_v34 = vld [vmem:[%s3241_s1 + $0x80] sm:$0xff]   ;;  %v93_v40 = vld [vmem:[%s3240_s0 + $0x50] sm:$0xff] }
  0x41   :  { %2088 = vmatprep.subr.bf16.mxu1 %v2309_v14  ;;  %v133_v33 = vpack.c.bf16 %v91_v32, %v84_v31  ;;  %v83_v35 = vld [vmem:[%s3240_s0] sm:$0xff]  ;;  %v135_v41 = vpack.c.bf16 %v93_v40, %v86_v39  ;;  %v2328_v42 = vld [vmem:[%s3241_s1 + $0x138] sm:$0xff]   ;;  %v85_v43 = vld [vmem:[%s3240_s0 + $0x10] sm:$0xff] }
  0x42   :  { %2049 = vmatpush3.bf16.msra.mxu0 %v2308_v13  ;;  %v132_v37 = vpack.c.bf16 %v90_v36, %v83_v35  ;;  %v92_v44 = vld [vmem:[%s3240_s0 + $0x48] sm:$0xff]  ;;  %v2329_v46 = vld [vmem:[%s3241_s1 + $0x170] sm:$0xff]   ;;  %v98_v48 = vld [vmem:[%s3240_s0 + $0x78] sm:$0xff] }
  0x43   :  { %2050 = vmatprep.subr.bf16.mxu0 %v2311_v16  ;;  %604 = vmatprep.mubr.bf16.mxu0 %v133_v33  ;;  %v134_v45 = vpack.c.bf16 %v92_v44, %v85_v43  ;;  %v2330_v47 = vld [vmem:[%s3241_s1 + $0x130] sm:$0xff]   ;;  %v104_v51 = vld [vmem:[%s3240_s0 + $0xa8] sm:$0xff]  ;;  %v107_v56 = vld [vmem:[%s3240_s0 + $0xc0] sm:$0xff] }
  0x44   :  { %2089 = vmatpush3.bf16.msra.mxu1 %v2310_v15  ;;  %668 = vmatprep.mubr.bf16.mxu1 %v135_v41  ;;  %v105_v49 = vld [vmem:[%s3240_s0 + $0xb0] sm:$0xff]  ;;  %v2331_v54 = vld [vmem:[%s3241_s1 + $0x168] sm:$0xff]   ;;  %v99_v59 = vld [vmem:[%s3240_s0 + $0x80] sm:$0xff] }
  0x45   :  { %2090 = vmatprep.subr.bf16.mxu1 %v2313_v18  ;;  %v97_v50 = vld [vmem:[%s3240_s0 + $0x70] sm:$0xff]  ;;  %v140_v52 = vpack.c.bf16 %v105_v49, %v98_v48  ;;  %v100_v55 = vld [vmem:[%s3240_s0 + $0x88] sm:$0xff]  ;;  %v106_v60 = vld [vmem:[%s3240_s0 + $0xb8] sm:$0xff] }
  0x46   :  { %2051 = vmatpush3.bf16.msra.mxu0 %v2312_v17  ;;  %v139_v53 = vpack.c.bf16 %v104_v51, %v97_v50  ;;  %v142_v57 = vpack.c.bf16 %v107_v56, %v100_v55  ;;  %v2332_v58 = vld [vmem:[%s3241_s1 + $0x128] sm:$0xff]   ;;  %v141_v61 = vpack.c.bf16 %v106_v60, %v99_v59  ;;  %v2333_v62 = vld [vmem:[%s3241_s1 + $0x180] sm:$0xff]   ;;  %v118_v5 = vld [vmem:[%s3240_s0 + $0x118] sm:$0xff] }
  0x47   :  { %2052 = vmatprep.subr.bf16.mxu0 %v2315_v20  ;;  %v2334_v63 = vld [vmem:[%s3241_s1 + $0x160] sm:$0xff]   ;;  %v112_v1 = vld [vmem:[%s3240_s0 + $0xe8] sm:$0xff]  ;;  %v2336_v7 = vld [vmem:[%s3241_s1 + $0x158] sm:$0xff]  }
  0x48   :  { %2091 = vmatpush3.bf16.msra.mxu1 %v2314_v19  ;;  %v2335_v0 = vld [vmem:[%s3241_s1 + $0x120] sm:$0xff]   ;;  %v114_v8 = vld [vmem:[%s3240_s0 + $0xf8] sm:$0xff]  ;;  %v121_v9 = vld [vmem:[%s3240_s0 + $0x130] sm:$0xff] }
  0x49   :  { %2092 = vmatprep.subr.bf16.mxu1 %v2317_v22  ;;  %v119_v2 = vld [vmem:[%s3240_s0 + $0x120] sm:$0xff]  ;;  %v149_v10 = vpack.c.bf16 %v121_v9, %v114_v8  ;;  %v2337_v11 = vld [vmem:[%s3241_s1 + $0x118] sm:$0xff]   ;;  %v113_v12 = vld [vmem:[%s3240_s0 + $0xf0] sm:$0xff] }
  0x4a   :  { %2053 = vmatpush3.bf16.msra.mxu0 %v2316_v21  ;;  %v147_v3 = vpack.c.bf16 %v119_v2, %v112_v1  ;;  %v111_v4 = vld [vmem:[%s3240_s0 + $0xe0] sm:$0xff]  ;;  %v120_v13 = vld [vmem:[%s3240_s0 + $0x128] sm:$0xff]  ;;  %v2338_v15 = vld [vmem:[%s3241_s1 + $0x150] sm:$0xff]  }
  0x4b   :  { %2054 = vmatprep.subr.bf16.mxu0 %v2319_v24  ;;  %v146_v6 = vpack.c.bf16 %v118_v5, %v111_v4  ;;  %v148_v14 = vpack.c.bf16 %v120_v13, %v113_v12  ;;  %v2339_v16 = vld [vmem:[%s3241_s1 + $0x110] sm:$0xff]   ;;  %v126_v17 = vld [vmem:[%s3240_s0 + $0x158] sm:$0xff]  ;;  %v2340_v20 = vld [vmem:[%s3241_s1 + $0x148] sm:$0xff]  }
  0x4c   :  { %2093 = vmatpush3.bf16.msra.mxu1 %v2318_v23  ;;  %v125_v18 = vld [vmem:[%s3240_s0 + $0x150] sm:$0xff]  ;;  %v154_v19 = vpack.c.bf16 %v126_v17, %v126_v17  ;;  %v128_v21 = vld [vmem:[%s3240_s0 + $0x168] sm:$0xff]  ;;  %v127_v24 = vld [vmem:[%s3240_s0 + $0x160] sm:$0xff] }
  0x4d   :  { %2094 = vmatprep.subr.bf16.mxu1 %v2321_v26  ;;  %v156_v22 = vpack.c.bf16 %v128_v21, %v128_v21  ;;  %v153_v23 = vpack.c.bf16 %v125_v18, %v125_v18  ;;  %v2342_v26 = vld [vmem:[%s3241_s1 + $0x140] sm:$0xff]   ;;  %v89_v31 = vld [vmem:[%s3240_s0 + $0x30] sm:$0xff]  ;;  %v96_v32 = vld [vmem:[%s3240_s0 + $0x68] sm:$0xff] }
  0x4e   :  { %2055 = vmatpush3.bf16.msra.mxu0 %v2320_v25  ;;  %v2341_v25 = vld [vmem:[%s3241_s1 + $0x108] sm:$0xff]   ;;  %v2343_v33 = vld [vmem:[%s3241_s1 + $0x100] sm:$0xff]   ;;  %v94_v35 = vld [vmem:[%s3240_s0 + $0x58] sm:$0xff]  ;;  %v138_v36 = vpack.c.bf16 %v96_v32, %v89_v31 }
  0x4f   :  { %2056 = vmatprep.subr.bf16.mxu0 %v2323_v28  ;;  %v95_v28 = vld [vmem:[%s3240_s0 + $0x60] sm:$0xff]  ;;  %v110_v41 = vld [vmem:[%s3240_s0 + $0xd8] sm:$0xff]  ;;  %v124_v44 = vld [vmem:[%s3240_s0 + $0x148] sm:$0xff] }
  0x50   :  { %2095 = vmatpush3.bf16.msra.mxu1 %v2322_v27  ;;  %v88_v27 = vld [vmem:[%s3240_s0 + $0x28] sm:$0xff]  ;;  %v103_v40 = vld [vmem:[%s3240_s0 + $0xa0] sm:$0xff]  ;;  %v122_v55 = vld [vmem:[%s3240_s0 + $0x138] sm:$0xff] }
  0x51   :  { %2096 = vmatprep.subr.bf16.mxu1 %v2325_v30  ;;  %v137_v30 = vpack.c.bf16 %v95_v28, %v88_v27  ;;  %v116_v48 = vld [vmem:[%s3240_s0 + $0x108] sm:$0xff]  ;;  %v123_v49 = vld [vmem:[%s3240_s0 + $0x140] sm:$0xff]  ;;  %v129_v60 = vld [vmem:[%s3240_s0 + $0x170] sm:$0xff] }
  0x52   :  { %2057 = vmatpush3.bf16.msra.mxu0 %v2324_v29  ;;  %v155_v29 = vpack.c.bf16 %v127_v24, %v127_v24  ;;  %v131_v51 = vld [vmem:[%s3240_s0 + $0x180] sm:$0xff]  ;;  %v2348_v2 = vld [vmem:[#allocation2 + $0x18] sm:$0xff]   ;;  %v2350_v4 = vld [vmem:[#allocation2 + $0x8] sm:$0xff]  }
  0x53   :  { %2122 = vmatprep.subr.bf16.mxu0 %v2327_v38  ;;  %v109_v38 = vld [vmem:[%s3240_s0 + $0xd0] sm:$0xff]  ;;  %v159_v56 = vpack.c.bf16 %v131_v51, %v131_v51  ;;  %v2347_v1 = vld [vmem:[#allocation2 + $0x20] sm:$0xff]   ;;  %v2354_v8 = vld [vmem:[%s3245_s5 + $0x28] sm:$0xff]  }
  0x54   :  { %2097 = vmatpush3.bf16.msra.mxu1 %v2326_v34  ;;  %v87_v34 = vld [vmem:[%s3240_s0 + $0x20] sm:$0xff] }
  0x55   :  { %605 = vmatmul.mubr.bf16.vlgmr.msra.gmra.mxu0 %v132_v37  ;;  %2203 = vmatprep.subr.bf16.mxu1 %v2333_v62  ;;  %v102_v37 = vld [vmem:[%s3240_s0 + $0x98] sm:$0xff]  ;;  %v136_v39 = vpack.c.bf16 %v94_v35, %v87_v34  ;;  %v2351_v5 = vld [vmem:[#allocation2] sm:$0xff]  }
  0x56   :  { %2123 = vmatpush3.bf16.msra.mxu0 %v2328_v42  ;;  %612 = vmatprep.mubr.bf16.mxu0 %v140_v52  ;;  %v117_v42 = vld [vmem:[%s3240_s0 + $0x110] sm:$0xff]  ;;  %v144_v43 = vpack.c.bf16 %v109_v38, %v102_v37  ;;  %v2355_v9 = vld [vmem:[%s3245_s5 + $0x20] sm:$0xff]  }
  0x57   :  { %669 = vmatmul.mubr.bf16.vlgmr.msra.gmra.mxu1 %v134_v45  ;;  %2124 = vmatprep.subr.bf16.mxu0 %v2329_v46  ;;  %v145_v45 = vpack.c.bf16 %v110_v41, %v103_v40  ;;  %v101_v46 = vld [vmem:[%s3240_s0 + $0x90] sm:$0xff]  ;;  %v152_v50 = vpack.c.bf16 %v124_v44, %v117_v42  ;;  %v2940_v38 = vld [vmem:[%s3242_s2] ss:$0 sm:$0xff] }
  0x58   :  { %676 = vmatprep.mubr.bf16.mxu1 %v142_v57  ;;  %2204 = vmatpush3.bf16.msra.mxu1 %v2333_v62  ;;  %v130_v57 = vld [vmem:[%s3240_s0 + $0x178] sm:$0xff] }
  0x59   :  { %v158_v59 = vpack.c.bf16 %v130_v57, %v130_v57  ;;  %v2344_v62 = vld [vmem:[#allocation2 + $0x38] sm:$0xff]  }
  0x5a   :  { %2125 = vmatpush3.bf16.msra.mxu0 %v2330_v47  ;;  %v108_v47 = vld [vmem:[%s3240_s0 + $0xc8] sm:$0xff] }
  0x5b   :  { %2126 = vmatprep.subr.bf16.mxu0 %v2331_v54  ;;  %v143_v52 = vpack.c.bf16 %v108_v47, %v101_v46  ;;  %v115_v54 = vld [vmem:[%s3240_s0 + $0x100] sm:$0xff] }
  0x5d   :  { %613 = vmatmul.mubr.bf16.gmra.mxu0 %v139_v53  ;;  %v151_v53 = vpack.c.bf16 %v123_v49, %v116_v48 }
  0x5e   :  { %2127 = vmatpush3.bf16.msra.mxu0 %v2332_v58  ;;  %620 = vmatprep.mubr.bf16.mxu0 %v147_v3  ;;  %v150_v58 = vpack.c.bf16 %v122_v55, %v115_v54  ;;  %v2349_v3 = vld [vmem:[#allocation2 + $0x10] sm:$0xff]  }
  0x5f   :  { %677 = vmatmul.mubr.bf16.gmra.mxu1 %v141_v61  ;;  %2128 = vmatprep.subr.bf16.mxu0 %v2334_v63  ;;  %v157_v61 = vpack.c.bf16 %v129_v60, %v129_v60  ;;  %v2345_v63 = vld [vmem:[#allocation2 + $0x30] sm:$0xff]  }
  0x60   :  { %684 = vmatprep.mubr.bf16.mxu1 %v149_v10  ;;  %v2356_v10 = vld [vmem:[%s3245_s5 + $0x18] sm:$0xff]  }
  0x62   :  { %2129 = vmatpush3.bf16.msra.mxu0 %v2335_v0  ;;  %v2346_v0 = vld [vmem:[#allocation2 + $0x28] sm:$0xff]  }
  0x63   :  { %2130 = vmatprep.subr.bf16.mxu0 %v2336_v7  ;;  %v2353_v7 = vld [vmem:[%s3245_s5 + $0x30] sm:$0xff]  }
  0x65   :  { %621 = vmatmul.mubr.bf16.gmra.mxu0 %v146_v6  ;;  %v2352_v6 = vld [vmem:[%s3245_s5 + $0x38] sm:$0xff]  }
  0x66   :  { %2131 = vmatpush3.bf16.msra.mxu0 %v2337_v11  ;;  %628 = vmatprep.mubr.bf16.mxu0 %v154_v19 }
  0x67   :  { %2132 = vmatprep.subr.bf16.mxu0 %v2338_v15  ;;  %685 = vmatmul.mubr.bf16.gmra.mxu1 %v148_v14 }
  0x68   :  { %692 = vmatprep.mubr.bf16.mxu1 %v156_v22  ;;  %2237 = vmatprep.subr.bf16.mxu1 %v2352_v6 }
  0x6a   :  { %2133 = vmatpush3.bf16.msra.mxu0 %v2339_v16 }
  0x6b   :  { %2134 = vmatprep.subr.bf16.mxu0 %v2340_v20 }
  0x6d   :  { %629 = vmatmul.mubr.bf16.gmra.mxu0 %v153_v23 }
  0x6e   :  { %2135 = vmatpush3.bf16.msra.mxu0 %v2341_v25  ;;  %732 = vmatprep.mubr.bf16.mxu0 %v137_v30 }
  0x6f   :  { %2136 = vmatprep.subr.bf16.mxu0 %v2342_v26  ;;  %693 = vmatmul.mubr.bf16.gmra.mxu1 %v155_v29 }
  0x70   :  { %2205 = vmatprep.mubr.msk.bf16.mxu1 %vm559_vm0, %v138_v36 }
  0x72   :  { %2137 = vmatpush3.bf16.msra.mxu0 %v2343_v33 }
  0x73   :  { %2213 = vmatprep.subr.bf16.mxu0 %v2344_v62 }
  0x75   :  { %733 = vmatmul.mubr.bf16.vlgmr.msra.gmra.mxu0 %v136_v39 }
  0x76   :  { %740 = vmatprep.mubr.bf16.mxu0 %v144_v43  ;;  %2214 = vmatpush3.bf16.msra.mxu0 %v2344_v62 }
  0x77   :  { %2206 = vmatmul.mubr.msk.bf16.vlgmr.msra.gmra.mxu1 %vm559_vm0, %v145_v45  ;;  %2215 = vmatprep.subr.bf16.mxu0 %v2345_v63 }
  0x78   :  { %2209 = vmatprep.mubr.msk.bf16.mxu1 %vm559_vm0, %v152_v50  ;;  %2238 = vmatpush3.bf16.msra.mxu1 %v2352_v6 }
  0x79   :  { %2239 = vmatprep.subr.bf16.mxu1 %v2353_v7 }
  0x7a   :  { %2216 = vmatpush3.bf16.msra.mxu0 %v2345_v63 }
  0x7b   :  { %2217 = vmatprep.subr.bf16.mxu0 %v2346_v0 }
  0x7c   :  { %2240 = vmatpush3.bf16.msra.mxu1 %v2353_v7 }
  0x7d   :  { %741 = vmatmul.mubr.bf16.gmra.mxu0 %v143_v52  ;;  %2241 = vmatprep.subr.bf16.mxu1 %v2354_v8 }
  0x7e   :  { %748 = vmatprep.mubr.bf16.mxu0 %v151_v53  ;;  %2218 = vmatpush3.bf16.msra.mxu0 %v2346_v0 }
  0x7f   :  { %2210 = vmatmul.mubr.msk.bf16.gmra.mxu1 %vm559_vm0, %v159_v56  ;;  %2219 = vmatprep.subr.bf16.mxu0 %v2347_v1 }
  0x80   :  { %2242 = vmatpush3.bf16.msra.mxu1 %v2354_v8 }
  0x81   :  { %2243 = vmatprep.subr.bf16.mxu1 %v2355_v9 }
  0x82   :  { %2220 = vmatpush3.bf16.msra.mxu0 %v2347_v1 }
  0x83   :  { %2221 = vmatprep.subr.bf16.mxu0 %v2348_v2 }
  0x84   :  { %2244 = vmatpush3.bf16.msra.mxu1 %v2355_v9 }
  0x85   :  { %749 = vmatmul.mubr.bf16.gmra.mxu0 %v150_v58  ;;  %2245 = vmatprep.subr.bf16.mxu1 %v2356_v10 }
  0x86   :  { %756 = vmatprep.mubr.bf16.mxu0 %v158_v59  ;;  %2222 = vmatpush3.bf16.msra.mxu0 %v2348_v2 }
  0x87   :  { %2223 = vmatprep.subr.bf16.mxu0 %v2349_v3 }
  0x88   :  { %2246 = vmatpush3.bf16.msra.mxu1 %v2356_v10 }
  0x8a   :  { %2224 = vmatpush3.bf16.msra.mxu0 %v2349_v3 }
  0x8b   :  { %2225 = vmatprep.subr.bf16.mxu0 %v2350_v4 }
  0x8d   :  { %757 = vmatmul.mubr.bf16.gmra.mxu0 %v157_v61 }
  0x8e   :  { %2226 = vmatpush3.bf16.msra.mxu0 %v2350_v4 }
  0x8f   :  { %2227 = vmatprep.subr.bf16.mxu0 %v2351_v5 }
  0x92   :  { %2228 = vmatpush3.bf16.msra.mxu0 %v2351_v5 }
 0x115   :  { %v2058_v11 = vpop.f32.mrf.mxu0 }
 0x117   :  { %v2059_v12 = vpop.f32.mrf.mxu0  ;;  %v2098_v13 = vpop.f32.mrf.mxu1 }
 0x118   :  { %v2060_v36 = vadd.f32 %v2059_v12, %v2058_v11 }
 0x119   :  { %v2061_v14 = vpop.f32.mrf.mxu0  ;;  %v2099_v15 = vpop.f32.mrf.mxu1 }
 0x11a   :  { %v607_v42 = vadd.f32 %v2060_v36, %v2940_v38  ;;  %v2100_v43 = vadd.f32 %v2099_v15, %v2098_v13 }
 0x11b   :  { %v2062_v16 = vpop.f32.mrf.mxu0  ;;  %v2101_v17 = vpop.f32.mrf.mxu1 }
 0x11c   :  { %v2063_v45 = vadd.f32 %v2062_v16, %v2061_v14  ;;  %v671_v49 = vadd.f32 %v2100_v43, %v607_v42 }
 0x11d   :  { %v2064_v18 = vpop.f32.mrf.mxu0  ;;  %v2102_v19 = vpop.f32.mrf.mxu1 }
 0x11e   :  { %v610_v51 = vadd.f32 %v2063_v45, %v2940_v38  ;;  %v2103_v52 = vadd.f32 %v2102_v19, %v2101_v17 }
 0x11f   :  { %v2065_v20 = vpop.f32.mrf.mxu0  ;;  %v2104_v21 = vpop.f32.mrf.mxu1 }
 0x120   :  { %v2066_v53 = vadd.f32 %v2065_v20, %v2064_v18  ;;  %v674_v61 = vadd.f32 %v2103_v52, %v610_v51 }
 0x121   :  { %v2067_v22 = vpop.f32.mrf.mxu0  ;;  %v2105_v23 = vpop.f32.mrf.mxu1 }
 0x122   :  { %v615_v62 = vadd.f32 %v2066_v53, %v2940_v38  ;;  %v2106_v63 = vadd.f32 %v2105_v23, %v2104_v21 }
 0x123   :  { %v2068_v24 = vpop.f32.mrf.mxu0  ;;  %v2107_v25 = vpop.f32.mrf.mxu1 }
 0x124   :  { %v2069_v59 = vadd.f32 %v2068_v24, %v2067_v22  ;;  %v679_v9 = vadd.f32 %v2106_v63, %v615_v62 }
 0x125   :  { %v2070_v26 = vpop.f32.mrf.mxu0  ;;  %v2108_v27 = vpop.f32.mrf.mxu1 }
 0x126   :  { %v618_v6 = vadd.f32 %v2069_v59, %v2940_v38  ;;  %v2109_v7 = vadd.f32 %v2108_v27, %v2107_v25 }
 0x127   :  { %v2071_v28 = vpop.f32.mrf.mxu0  ;;  %v2110_v29 = vpop.f32.mrf.mxu1 }
 0x128   :  { %v2072_v10 = vadd.f32 %v2071_v28, %v2070_v26  ;;  %v682_v19 = vadd.f32 %v2109_v7, %v618_v6  ;;  %v2368_v6 = vld [vmem:[%s3247_s7 + $0x154] ss:$28 sps:$4 sm:$0xff]  }
 0x129   :  { %v2073_v30 = vpop.f32.mrf.mxu0  ;;  %v2111_v31 = vpop.f32.mrf.mxu1  ;;  %v2366_v7 = vld [vmem:[%s3247_s7 + $0x150] ss:$28 sps:$4 sm:$0xff]  }
 0x12a   :  { %v623_v22 = vadd.f32 %v2072_v10, %v2940_v38  ;;  %v2112_v23 = vadd.f32 %v2111_v31, %v2110_v29  ;;  %v2380_v10 = vld [vmem:[%s3247_s7 + $0xe4] ss:$28 sps:$4 sm:$0xff]  }
 0x12b   :  { %v2074_v32 = vpop.f32.mrf.mxu0  ;;  %v2933_v33 = vpop.f32.mrf.mxu1 }
 0x12c   :  { %v2075_v20 = vadd.f32 %v2074_v32, %v2073_v30 }
 0x12d   :  { %v2935_v34 = vpop.f32.mrf.mxu0  ;;  %v2114_v35 = vpop.f32.mrf.mxu1 }
 0x12e   :  { %v626_v28 = vadd.f32 %v2075_v20, %v2940_v38  ;;  %v2115_v42 = vadd.f32 %v2114_v35, %v2933_v33 }
 0x12f   :  { %v2077_v37 = vpop.f32.mrf.mxu0  ;;  %v2942_v39 = vpop.f32.mrf.mxu1 }
 0x130   :  { %v2078_v45 = vadd.f32 %v2077_v37, %v2935_v34 }
 0x131   :  { %v2079_v40 = vpop.f32.mrf.mxu0  ;;  %v2944_v41 = vpop.f32.mrf.mxu1 }
 0x132   :  { %v2118_v51 = vadd.f32 %v2944_v41, %v2942_v39 }
 0x133   :  { %v2080_v44 = vpop.f32.mrf.mxu0  ;;  %v2119_v46 = vpop.f32.mrf.mxu1 }
 0x134   :  { %v687_v44 = vadd.f32 %v2112_v23, %v623_v22 }
 0x135   :  { %v2138_v47 = vpop.f32.mrf.mxu0  ;;  %v2120_v48 = vpop.f32.mrf.mxu1 }
 0x136   :  { %v690_v48 = vadd.f32 %v2115_v42, %v626_v28  ;;  %v2371_v42 = vld [vmem:[%s3247_s7 + $0x15c] ss:$28 sps:$4 sm:$0xff]  }
 0x137   :  { %v2139_v50 = vpop.f32.mrf.mxu0  ;;  %v2207_v55 = vpop.f32.mrf.mxu1 }
 0x138   :  { %v2140_v54 = vadd.f32 %v2139_v50, %v2138_v47  ;;  %v631_v50 = vadd.f32 %v2078_v45, %v2940_v38 }
 0x139   :  { %v2141_v56 = vpop.f32.mrf.mxu0  ;;  %v798_v58 = vpop.f32.mrf.mxu1 }
 0x13a   :  { %v735_v57 = vadd.f32 %v2140_v54, %v671_v49 }
 0x13b   :  { %v2142_v60 = vpop.f32.mrf.mxu0  ;;  %v2208_v1 = vpop.f32.mrf.mxu1 }
 0x13c   :  { %v2143_v0 = vadd.f32 %v2142_v60, %v2141_v56  ;;  %v799_v3 = vadd.f32 %v798_v58, %v735_v57 }
 0x13d   :  { %v2144_v2 = vpop.f32.mrf.mxu0  ;;  %v801_v5 = vpop.f32.mrf.mxu1 }
 0x13e   :  { %v738_v4 = vadd.f32 %v2143_v0, %v674_v61  ;;  %v828_v15 = vmax.f32 %v799_v3, 0.0  ;;  %v2357_v0 = vld [vmem:[%s3245_s5 + $0x10] sm:$0xff]   ;;  %v2360_v3 = vld [vmem:[%s3247_s7 + $0x188] ss:$28 sps:$4 sm:$0xff]  }
 0x13f   :  { %v2145_v8 = vpop.f32.mrf.mxu0  ;;  %v2211_v13 = vpop.f32.mrf.mxu1  ;;  %2247 = vmatprep.subr.bf16.mxu1 %v2357_v0 }
 0x140   :  { %v2146_v11 = vadd.f32 %v2145_v8, %v2144_v2  ;;  %v802_v12 = vadd.f32 %v801_v5, %v738_v4  ;;  %2248 = vmatpush3.bf16.msra.mxu1 %v2357_v0  ;;  %v2359_v2 = vld [vmem:[%s3245_s5] sm:$0xff]   ;;  %v2362_v4 = vld [vmem:[%s3247_s7 + $0x18c] ss:$28 sps:$4 sm:$0xff]   ;;  %v2365_v5 = vld [vmem:[%s3247_s7 + $0x194] ss:$28 sps:$4 sm:$0xff]   ;;  %v2554_v0 = vmov 0  }
 0x141   :  { %v2147_v14 = vpop.f32.mrf.mxu0  ;;  %v814_v18 = vpop.f32.mrf.mxu1  ;;  %1520 = vmatprep.subr.bf16.mxu0 %v2362_v4  ;;  %v2374_v8 = vld [vmem:[%s3247_s7 + $0x11c] ss:$28 sps:$4 sm:$0xff]  }
 0x142   :  { %v743_v16 = vadd.f32 %v2146_v11, %v679_v9  ;;  %v829_v17 = vmax.f32 %v802_v12, 0.0  ;;  %v2372_v9 = vld [vmem:[%s3247_s7 + $0x118] ss:$28 sps:$4 sm:$0xff]   ;;  %v2378_v11 = vld [vmem:[%s3247_s7 + $0xe0] ss:$28 sps:$4 sm:$0xff]  }
 0x143   :  { %v2148_v21 = vpop.f32.mrf.mxu0  ;;  %v2212_v25 = vpop.f32.mrf.mxu1  ;;  %v2386_v12 = vld [vmem:[%s3247_s7 + $0xac] ss:$28 sps:$4 sm:$0xff]  }
 0x144   :  { %v835_v24 = vpack.c.bf16 %v829_v17, %v828_v15  ;;  %v2149_v36 = vadd.f32 %v2148_v21, %v2147_v14  ;;  %v807_v40 = vadd.f32 %v2207_v55, %v743_v16  ;;  %v695_v55 = vadd.f32 %v2118_v51, %v631_v50  ;;  %v1968_v16 = vld [vmem:[#allocation5] ss:$0 sm:$0xff] }
 0x145   :  { %v2150_v27 = vpop.f32.mrf.mxu0  ;;  %v817_v35 = vpop.f32.mrf.mxu1 }
 0x146   :  { %v746_v26 = vadd.f32 %v2149_v36, %v682_v19  ;;  %2229 = vmatprep.mubr.bf16.mxu0 %v835_v24  ;;  %v830_v47 = vmax.f32 %v807_v40, 0.0  ;;  %v2363_v40 = vld [vmem:[%s3247_s7 + $0x190] ss:$28 sps:$4 sm:$0xff]  }
 0x147   :  { %v2151_v43 = vpop.f32.mrf.mxu0 }
 0x148   :  { %v810_v30 = vadd.f32 %v2208_v1, %v746_v26  ;;  %v2152_v32 = vadd.f32 %v2151_v43, %v2150_v27  ;;  %v2358_v1 = vld [vmem:[%s3245_s5 + $0x8] sm:$0xff]  }
 0x149   :  { %v2153_v46 = vpop.f32.mrf.mxu0  ;;  %2249 = vmatprep.subr.bf16.mxu1 %v2358_v1 }
 0x14a   :  { %v831_v29 = vmax.f32 %v810_v30, 0.0  ;;  %v751_v31 = vadd.f32 %v2152_v32, %v687_v44  ;;  %2250 = vmatpush3.bf16.msra.mxu1 %v2358_v1  ;;  %v2369_v44 = vld [vmem:[%s3247_s7 + $0x158] ss:$28 sps:$4 sm:$0xff]   ;;  %v2377_v32 = vld [vmem:[%s3247_s7 + $0x124] ss:$28 sps:$4 sm:$0xff]  }
 0x14b   :  { %v2154_v49 = vpop.f32.mrf.mxu0  ;;  %2251 = vmatprep.subr.bf16.mxu1 %v2359_v2 }
 0x14c   :  { %v836_v52 = vpack.c.bf16 %v831_v29, %v830_v47  ;;  %v2155_v53 = vadd.f32 %v2154_v49, %v2153_v46  ;;  %v815_v54 = vadd.f32 %v814_v18, %v751_v31  ;;  %v2375_v31 = vld [vmem:[%s3247_s7 + $0x120] ss:$28 sps:$4 sm:$0xff]   ;;  %v2383_v49 = vld [vmem:[%s3247_s7 + $0xec] ss:$28 sps:$4 sm:$0xff]  }
 0x14d   :  { %v2156_v33 = vpop.f32.mrf.mxu0 }
 0x14e   :  { %2230 = vmatmul.mubr.bf16.vlgmr.msra.gmra.mxu0 %v836_v52  ;;  %v754_v34 = vadd.f32 %v2155_v53, %v690_v48  ;;  %v832_v59 = vmax.f32 %v815_v54, 0.0  ;;  %2252 = vmatpush3.bf16.msra.mxu1 %v2359_v2  ;;  %v2381_v53 = vld [vmem:[%s3247_s7 + $0xe8] ss:$28 sps:$4 sm:$0xff]   ;;  %v2387_v54 = vld [vmem:[%s3247_s7 + $0xb0] ss:$28 sps:$4 sm:$0xff]  }
 0x14f   :  { %v2157_v37 = vpop.f32.mrf.mxu0  ;;  %1591 = vmatprep.subr.bf16.mxu1 %v2365_v5  ;;  %1521 = vmatpush1.bf16.msra.mxu0 %v2360_v3  ;;  %v1977_v3 = vld [vmem:[#allocation7] ss:$0 sm:$0xff] }
 0x150   :  { %v2158_v56 = vadd.f32 %v2157_v37, %v2156_v33  ;;  %v818_v57 = vadd.f32 %v817_v35, %v754_v34  ;;  %1522 = vmatprep.subr.bf16.mxu0 %v2368_v6  ;;  %v2389_v35 = vld [vmem:[%s3247_s7 + $0xb4] ss:$28 sps:$4 sm:$0xff]   ;;  %v2395_v37 = vld [vmem:[%s3247_s7 + $0x7c] ss:$28 sps:$4 sm:$0xff]  }
 0x151   :  { %v2159_v58 = vpop.f32.mrf.mxu0  ;;  %v2392_v34 = vld [vmem:[%s3247_s7 + $0x74] ss:$28 sps:$4 sm:$0xff]  }
 0x152   :  { %v759_v60 = vadd.f32 %v2158_v56, %v695_v55  ;;  %v833_v61 = vmax.f32 %v818_v57, 0.0  ;;  %v2390_v55 = vld [vmem:[%s3247_s7 + $0x70] ss:$28 sps:$4 sm:$0xff]   ;;  %v2393_v56 = vld [vmem:[%s3247_s7 + $0x78] ss:$28 sps:$4 sm:$0xff]  }
 0x153   :  { %v2160_v62 = vpop.f32.mrf.mxu0  ;;  %1523 = vmatpush1.bf16.msra.mxu0 %v2366_v7  ;;  %v2398_v57 = vld [vmem:[%s3247_s7 + $0x3c] ss:$28 sps:$4 sm:$0xff]   ;;  %v2401_v58 = vld [vmem:[%s3247_s7 + $0x44] ss:$28 sps:$4 sm:$0xff]  }
 0x154   :  { %v823_v38 = vadd.f32 %v2211_v13, %v759_v60  ;;  %v837_v63 = vpack.c.bf16 %v833_v61, %v832_v59  ;;  %1524 = vmatprep.subr.bf16.mxu0 %v2374_v8  ;;  %v2384_v13 = vld [vmem:[%s3247_s7 + $0xa8] ss:$28 sps:$4 sm:$0xff]   ;;  %v2396_v59 = vld [vmem:[%s3247_s7 + $0x38] ss:$28 sps:$4 sm:$0xff]   ;;  %v2399_v60 = vld [vmem:[%s3247_s7 + $0x40] ss:$28 sps:$4 sm:$0xff]  }
 0x155   :  { %v2404_v61 = vld [vmem:[%s3247_s7 + $0x4] ss:$28 sps:$4 sm:$0xff]   ;;  %v2407_v62 = vld [vmem:[%s3247_s7 + $0xc] ss:$28 sps:$4 sm:$0xff]  }
 0x156   :  { %2233 = vmatprep.mubr.bf16.mxu0 %v837_v63  ;;  %v834_v39 = vmax.f32 %v823_v38, 0.0  ;;  %v2402_v38 = vld [vmem:[%s3247_s7] ss:$28 sps:$4 sm:$0xff]   ;;  %v2405_v63 = vld [vmem:[%s3247_s7 + $0x8] ss:$28 sps:$4 sm:$0xff]  }
 0x157   :  { %1525 = vmatpush1.bf16.msra.mxu0 %v2372_v9 }
 0x158   :  { %v838_v41 = vpack.c.bf16 %v834_v39, %v834_v39  ;;  %1526 = vmatprep.subr.bf16.mxu0 %v2380_v10  ;;  %v2410_v39 = vld [vmem:[%s3247_s7 + $0x19c] ss:$28 sps:$4 sm:$0xff]  }
 0x159   :  { %v2408_v10 = vld [vmem:[%s3247_s7 + $0x198] ss:$28 sps:$4 sm:$0xff]  }
 0x15a   :  { %2234 = vmatmul.mubr.bf16.gmra.mxu0 %v838_v41  ;;  %v2411_v41 = vld [vmem:[%s3247_s7 + $0x1a0] ss:$28 sps:$4 sm:$0xff]  }
 0x15b   :  { %1527 = vmatpush1.bf16.msra.mxu0 %v2378_v11  ;;  %1552 = vmatprep.mubr.bf16.mxu0 %v2554_v0 }
 0x15c   :  { %1528 = vmatprep.subr.bf16.mxu0 %v2386_v12 }
 0x15f   :  { %1529 = vmatpush1.bf16.msra.mxu0 %v2384_v13  ;;  %v2414_v13 = vld [vmem:[%s3247_s7 + $0x164] ss:$28 sps:$4 sm:$0xff]  }
 0x160   :  { %1530 = vmatprep.subr.bf16.mxu0 %v2392_v34  ;;  %v1197_v34 = vlaneseq }
 0x163   :  { %1531 = vmatpush1.bf16.msra.mxu0 %v2390_v55 }
 0x164   :  { %1532 = vmatprep.subr.bf16.mxu0 %v2398_v57  ;;  %v3162_v57 = vld [vmem:[#allocation8] sm:$0x7f] }
 0x167   :  { %1533 = vmatpush1.bf16.msra.mxu0 %v2396_v59 }
 0x168   :  { %1534 = vmatprep.subr.bf16.mxu0 %v2404_v61 }
 0x16b   :  { %1535 = vmatpush1.bf16.msra.mxu0 %v2402_v38 }
 0x16c   :  { %1662 = vmatprep.subr.bf16.mxu0 %v2410_v39 }
 0x20e   :  { %v2231_v14 = vpop.f32.mrf.mxu0 }
 0x20f   :  { %v953_v20 = vadd.f32 %v2231_v14, %v1968_v16  ;;  %v2415_v14 = vld [vmem:[%s3247_s7 + $0x168] ss:$28 sps:$4 sm:$0xff]  }
 0x210   :  { %v944_v15 = vpop.f32.mrf.mxu0 }
 0x211   :  { %v945_v18 = vadd.f32 %v1968_v16, %v944_v15  ;;  %v976_v25 = vmax.f32 %v953_v20, 0.0  ;;  %v2418_v20 = vld [vmem:[%s3247_s7 + $0x12c] ss:$28 sps:$4 sm:$0xff]  }
 0x212   :  { %v2232_v17 = vpop.f32.mrf.mxu0 }
 0x213   :  { %v956_v19 = vadd.f32 %v2232_v17, %v1968_v16  ;;  %v974_v24 = vmax.f32 %v945_v18, 0.0  ;;  %v2412_v18 = vld [vmem:[%s3247_s7 + $0x160] ss:$28 sps:$4 sm:$0xff]  }
 0x214   :  { %v947_v21 = vpop.f32.mrf.mxu0 }
 0x215   :  { %v948_v22 = vadd.f32 %v1968_v16, %v947_v21  ;;  %v977_v23 = vmax.f32 %v956_v19, 0.0  ;;  %v2419_v21 = vld [vmem:[%s3247_s7 + $0x130] ss:$28 sps:$4 sm:$0xff]  }
 0x217   :  { %v975_v36 = vmax.f32 %v948_v22, 0.0  ;;  %v982_v26 = vpack.c.bf16 %v977_v23, %v976_v25 }
 0x219   :  { %v981_v27 = vpack.c.bf16 %v975_v36, %v974_v24  ;;  %v2416_v36 = vld [vmem:[%s3247_s7 + $0x128] ss:$28 sps:$4 sm:$0xff]  }
 0x21a   :  { %v2235_v28 = vpop.f32.mrf.mxu0 }
 0x21b   :  { %2253 = vmatprep.mubr.bf16.mxu1 %v981_v27  ;;  %v969_v45 = vadd.f32 %v2235_v28, %v1968_v16 }
 0x21c   :  { %v960_v43 = vpop.f32.mrf.mxu0  ;;  %2254 = vmatmul.mubr.bf16.vlgmr.msra.gmra.mxu1 %v982_v26  ;;  %v2423_v26 = vld [vmem:[%s3247_s7 + $0xf8] ss:$28 sps:$4 sm:$0xff]  }
 0x21d   :  { %1592 = vmatpush1.bf16.msra.mxu1 %v2363_v40  ;;  %v961_v46 = vadd.f32 %v1968_v16, %v960_v43  ;;  %v980_v48 = vmax.f32 %v969_v45, 0.0  ;;  %v2422_v40 = vld [vmem:[%s3247_s7 + $0xf4] ss:$28 sps:$4 sm:$0xff]   ;;  %v2427_v45 = vld [vmem:[%s3247_s7 + $0xc0] ss:$28 sps:$4 sm:$0xff]  }
 0x21e   :  { %v2236_v30 = vpop.f32.mrf.mxu0  ;;  %1593 = vmatprep.subr.bf16.mxu1 %v2371_v42  ;;  %v2420_v42 = vld [vmem:[%s3247_s7 + $0xf0] ss:$28 sps:$4 sm:$0xff]  }
 0x21f   :  { %v978_v50 = vmax.f32 %v961_v46, 0.0  ;;  %v984_v33 = vpack.c.bf16 %v980_v48, %v980_v48  ;;  %v2428_v48 = vld [vmem:[%s3247_s7 + $0x80] ss:$28 sps:$4 sm:$0xff]  }
 0x220   :  { %v963_v47 = vpop.f32.mrf.mxu0 }
 0x221   :  { %v964_v29 = vadd.f32 %v1968_v16, %v963_v47  ;;  %1594 = vmatpush1.bf16.msra.mxu1 %v2369_v44  ;;  %v2426_v44 = vld [vmem:[%s3247_s7 + $0xbc] ss:$28 sps:$4 sm:$0xff]  }
 0x222   :  { %1595 = vmatprep.subr.bf16.mxu1 %v2377_v32  ;;  %v2424_v32 = vld [vmem:[%s3247_s7 + $0xb8] ss:$28 sps:$4 sm:$0xff]  }
 0x223   :  { %v979_v51 = vmax.f32 %v964_v29, 0.0  ;;  %v2430_v29 = vld [vmem:[%s3247_s7 + $0x84] ss:$28 sps:$4 sm:$0xff]  }
 0x225   :  { %v983_v52 = vpack.c.bf16 %v979_v51, %v978_v50  ;;  %1596 = vmatpush1.bf16.msra.mxu1 %v2375_v31  ;;  %v2431_v31 = vld [vmem:[%s3247_s7 + $0x88] ss:$28 sps:$4 sm:$0xff]   ;;  %v2435_v51 = vld [vmem:[%s3247_s7 + $0x50] ss:$28 sps:$4 sm:$0xff]  }
 0x226   :  { %1597 = vmatprep.subr.bf16.mxu1 %v2383_v49  ;;  %v2434_v50 = vld [vmem:[%s3247_s7 + $0x4c] ss:$28 sps:$4 sm:$0xff]  }
 0x227   :  { %2257 = vmatprep.mubr.bf16.mxu1 %v983_v52  ;;  %v2432_v52 = vld [vmem:[%s3247_s7 + $0x48] ss:$28 sps:$4 sm:$0xff]  }
 0x228   :  { %2258 = vmatmul.mubr.bf16.gmra.mxu1 %v984_v33  ;;  %v2438_v33 = vld [vmem:[%s3247_s7 + $0x14] ss:$28 sps:$4 sm:$0xff]  }
 0x229   :  { %1598 = vmatpush1.bf16.msra.mxu1 %v2381_v53  ;;  %1623 = vmatprep.mubr.bf16.mxu1 %v2554_v0 }
 0x22a   :  { %1599 = vmatprep.subr.bf16.mxu1 %v2389_v35  ;;  %v2439_v35 = vld [vmem:[%s3247_s7 + $0x18] ss:$28 sps:$4 sm:$0xff]  }
 0x22d   :  { %1600 = vmatpush1.bf16.msra.mxu1 %v2387_v54  ;;  %v2436_v54 = vld [vmem:[%s3247_s7 + $0x10] ss:$28 sps:$4 sm:$0xff]   ;;  %s2555_s7 = smov [#allocation10]  }
 0x22e   :  { %1601 = vmatprep.subr.bf16.mxu1 %v2395_v37  ;;  %v3158_v37 = vshrl.u32 %v1197_v34, 7  ;;  %s1900_s8 = sshll.u32 %s2555_s7, 4  ;;  %s1901_s8 = int_to_ptr.vmem [resolvable:$true] %s1900_s8 }
 0x22f   :  { %s2520_s16 = scalar_lea.vmem %s1901_s8, 6272  ;;  %p2525_p7 = scmp.lt.s32.totalorder %s1901_s8, %s1901_s8 }
 0x230   :  { %v1199_v55 = vsub.s32 0, %v3158_v37  ;;  %v1211_v59 = vsub.s32 3, %v3158_v37  ;;  %p2521_p6 = scmp.ne.s32.totalorder %s1901_s8, %s2520_s16  ;;  %p2526_p8 = scmp.lt.s32.totalorder %s2520_s16, %s2520_s16 }
 0x231   :  { %1602 = vmatpush1.bf16.msra.mxu1 %v2393_v56  ;;  %v1207_v56 = vsub.s32 2, %v3158_v37 }
 0x232   :  { %1603 = vmatprep.subr.bf16.mxu1 %v2401_v58  ;;  %v1203_v58 = vsub.s32 1, %v3158_v37  ;;  %v3176_v38 = vrot.slane %v3162_v57, %v1211_v59  ;;  %p2527_p9 = por %p2526_p8, %p2525_p7 }
 0x233   :  { %v3170_v61 = vrot.slane %v3162_v57, %v1207_v56 }
 0x234   :  { %p2528_p10 = pnand %p2527_p9, %p2521_p6 }
 0x235   :  { %1604 = vmatpush1.bf16.msra.mxu1 %v2399_v60  ;;  %v3167_v60 = vrot.slane %v3162_v57, %v1199_v55 }
 0x236   :  { %1605 = vmatprep.subr.bf16.mxu1 %v2407_v62  ;;  %v3173_v62 = vrot.slane %v3162_v57, %v1203_v58 }
 0x239   :  { %1606 = vmatpush1.bf16.msra.mxu1 %v2405_v63 }
 0x23a   :  { %2261 = vmatprep.subr.bf16.mxu1 %v2411_v41 }
 0x2dc   :  { %v2255_v1 = vpop.f32.mrf.mxu1 }
 0x2dd   :  { %v1099_v16 = vadd.f32 %v2255_v1, %v1977_v3 }
 0x2de   :  { %v1090_v2 = vpop.f32.mrf.mxu1 }
 0x2df   :  { %v1091_v5 = vadd.f32 %v1977_v3, %v1090_v2  ;;  %v1122_v23 = vmax.f32 %v1099_v16, 0.0 }
 0x2e0   :  { %v2256_v4 = vpop.f32.mrf.mxu1 }
 0x2e1   :  { %v1120_v8 = vmax.f32 %v1091_v5, 0.0  ;;  %v1102_v11 = vadd.f32 %v2256_v4, %v1977_v3 }
 0x2e2   :  { %v1093_v6 = vpop.f32.mrf.mxu1 }
 0x2e3   :  { %v1094_v7 = vadd.f32 %v1977_v3, %v1093_v6  ;;  %v1123_v19 = vmax.f32 %v1102_v11, 0.0 }
 0x2e5   :  { %v1121_v9 = vmax.f32 %v1094_v7, 0.0  ;;  %v3097_v25 = vpack.c.bf16 %v1123_v19, %v1122_v23 }
 0x2e7   :  { %v3073_v12 = vpack.c.bf16 %v1121_v9, %v1120_v8 }
 0x2e8   :  { %v2259_v15 = vpop.f32.mrf.mxu1 }
 0x2e9   :  { %1553 = vmatmul.mubr.bf16.vlgmr.msra.gmra.mxu0 %v3073_v12  ;;  %1624 = vmatmul.mubr.bf16.vlgmr.msra.gmra.mxu1 %v3073_v12  ;;  %v1115_v46 = vadd.f32 %v2259_v15, %v1977_v3 }
 0x2ea   :  { %v1106_v17 = vpop.f32.mrf.mxu1  ;;  %1663 = vmatpush1.bf16.msra.mxu0 %v2408_v10  ;;  %2262 = vmatpush3.bf16.msra.mxu1 %v2411_v41 }
 0x2eb   :  { %1664 = vmatprep.subr.bf16.mxu0 %v2414_v13  ;;  %2263 = vmatprep.subr.bf16.mxu1 %v2415_v14  ;;  %v1107_v28 = vadd.f32 %v1977_v3, %v1106_v17  ;;  %v1126_v49 = vmax.f32 %v1115_v46, 0.0 }
 0x2ec   :  { %v2260_v22 = vpop.f32.mrf.mxu1  ;;  %1562 = vmatprep.mubr.bf16.mxu0 %v2554_v0  ;;  %1633 = vmatprep.mubr.bf16.mxu1 %v2554_v0 }
 0x2ed   :  { %v1124_v30 = vmax.f32 %v1107_v28, 0.0  ;;  %v1130_v53 = vpack.c.bf16 %v1126_v49, %v1126_v49 }
 0x2ee   :  { %v1109_v24 = vpop.f32.mrf.mxu1  ;;  %1665 = vmatpush1.bf16.msra.mxu0 %v2412_v18  ;;  %2264 = vmatpush3.bf16.msra.mxu1 %v2415_v14 }
 0x2ef   :  { %v1110_v27 = vadd.f32 %v1977_v3, %v1109_v24  ;;  %1666 = vmatprep.subr.bf16.mxu0 %v2418_v20  ;;  %2265 = vmatprep.subr.bf16.mxu1 %v2419_v21 }
 0x2f1   :  { %1563 = vmatmul.mubr.bf16.gmra.mxu0 %v3097_v25  ;;  %1634 = vmatmul.mubr.bf16.gmra.mxu1 %v3097_v25  ;;  %v1125_v43 = vmax.f32 %v1110_v27, 0.0 }
 0x2f2   :  { %1667 = vmatpush1.bf16.msra.mxu0 %v2416_v36  ;;  %2266 = vmatpush3.bf16.msra.mxu1 %v2419_v21 }
 0x2f3   :  { %1668 = vmatprep.subr.bf16.mxu0 %v2422_v40  ;;  %2267 = vmatprep.subr.bf16.mxu1 %v2423_v26  ;;  %v1129_v47 = vpack.c.bf16 %v1125_v43, %v1124_v30 }
 0x2f4   :  { %1572 = vmatprep.mubr.bf16.mxu0 %v2554_v0  ;;  %1643 = vmatprep.mubr.bf16.mxu1 %v2554_v0 }
 0x2f6   :  { %1669 = vmatpush1.bf16.msra.mxu0 %v2420_v42  ;;  %2268 = vmatpush3.bf16.msra.mxu1 %v2423_v26 }
 0x2f7   :  { %1670 = vmatprep.subr.bf16.mxu0 %v2426_v44  ;;  %2269 = vmatprep.subr.bf16.mxu1 %v2427_v45 }
 0x2f9   :  { %1573 = vmatmul.mubr.bf16.gmra.mxu0 %v1129_v47  ;;  %1644 = vmatmul.mubr.bf16.gmra.mxu1 %v1129_v47 }
 0x2fa   :  { %1671 = vmatpush1.bf16.msra.mxu0 %v2424_v32  ;;  %2270 = vmatpush3.bf16.msra.mxu1 %v2427_v45 }
 0x2fb   :  { %1672 = vmatprep.subr.bf16.mxu0 %v2430_v29  ;;  %2271 = vmatprep.subr.bf16.mxu1 %v2431_v31 }
 0x2fc   :  { %1582 = vmatprep.mubr.bf16.mxu0 %v2554_v0  ;;  %1653 = vmatprep.mubr.bf16.mxu1 %v2554_v0 }
 0x2fe   :  { %1673 = vmatpush1.bf16.msra.mxu0 %v2428_v48  ;;  %2272 = vmatpush3.bf16.msra.mxu1 %v2431_v31 }
 0x2ff   :  { %1674 = vmatprep.subr.bf16.mxu0 %v2434_v50  ;;  %2273 = vmatprep.subr.bf16.mxu1 %v2435_v51 }
 0x301   :  { %1583 = vmatmul.mubr.bf16.gmra.mxu0 %v1130_v53  ;;  %1654 = vmatmul.mubr.bf16.gmra.mxu1 %v1130_v53 }
 0x302   :  { %1675 = vmatpush1.bf16.msra.mxu0 %v2432_v52  ;;  %2274 = vmatpush3.bf16.msra.mxu1 %v2435_v51 }
 0x303   :  { %2277 = vmatprep.mubr.bf16.mxu1 %v3073_v12  ;;  %1676 = vmatprep.subr.bf16.mxu0 %v2438_v33 }
 0x304   :  { %2275 = vmatprep.subr.bf16.mxu1 %v2439_v35  ;;  %1694 = vmatprep.mubr.bf16.mxu0 %v2554_v0 }
 0x306   :  { %1677 = vmatpush1.bf16.msra.mxu0 %v2436_v54  ;;  %2276 = vmatpush3.bf16.msra.mxu1 %v2439_v35 }
 0x309   :  { %1695 = vmatmul.mubr.bf16.vlgmr.msra.gmra.mxu0 %v3073_v12  ;;  %2278 = vmatmul.mubr.bf16.vlgmr.msra.gmra.mxu1 %v3097_v25 }
 0x30a   :  { %2281 = vmatprep.mubr.bf16.mxu1 %v1129_v47  ;;  %1704 = vmatprep.mubr.bf16.mxu0 %v2554_v0 }
 0x311   :  { %1705 = vmatmul.mubr.bf16.gmra.mxu0 %v3097_v25  ;;  %2282 = vmatmul.mubr.bf16.gmra.mxu1 %v1130_v53 }
 0x312   :  { %1714 = vmatprep.mubr.bf16.mxu0 %v2554_v0 }
 0x319   :  { %1715 = vmatmul.mubr.bf16.gmra.mxu0 %v1129_v47 }
 0x31a   :  { %1724 = vmatprep.mubr.bf16.mxu0 %v2554_v0 }
 0x321   :  { %1725 = vmatmul.mubr.bf16.gmra.mxu0 %v1130_v53 }
 0x3a9   :  { %v1554_v63 = vpop.f32.mrf.mxu0  ;;  %v1625_v39 = vpop.f32.mrf.mxu1 }
 0x3aa   :  { %v1555_v41 = vadd.f32 %v1554_v63, %v3167_v60  ;;  %v1626_v0 = vadd.f32 %v1625_v39, %v3170_v61 }
 0x3ab   :  { %v1556_v1 = vpop.f32.mrf.mxu0  ;;  %v1627_v2 = vpop.f32.mrf.mxu1 }
 0x3ac   :  { %v1797_v3 = vmax.f32 %v1555_v41, 0.0  ;;  %v1799_v4 = vmax.f32 %v1626_v0, 0.0  ;;  %v1557_v5 = vadd.f32 %v1556_v1, %v3173_v62  ;;  %v1628_v6 = vadd.f32 %v1627_v2, %v3176_v38 }
 0x3ad   :  { %v1558_v7 = vpop.f32.mrf.mxu0  ;;  %v1629_v8 = vpop.f32.mrf.mxu1 }
 0x3ae   :  { %1846 = vst [vmem:[#allocation10] sm:$0xff] %v1797_v3  ;;  %1848 = vst [vmem:[#allocation10 + $0x10] sm:$0xff] %v1799_v4  ;;  %v1798_v9 = vmax.f32 %v1557_v5, 0.0  ;;  %v1800_v10 = vmax.f32 %v1628_v6, 0.0  ;;  %v1559_v11 = vadd.f32 %v1558_v7, %v3167_v60  ;;  %v1630_v12 = vadd.f32 %v1629_v8, %v3170_v61 }
 0x3af   :  { %v1560_v13 = vpop.f32.mrf.mxu0  ;;  %v1631_v14 = vpop.f32.mrf.mxu1 }
 0x3b0   :  { %1847 = vst [vmem:[#allocation10 + $0x8] sm:$0xff] %v1798_v9  ;;  %1849 = vst [vmem:[#allocation10 + $0x18] sm:$0xff] %v1800_v10  ;;  %v1804_v15 = vmax.f32 %v1559_v11, 0.0  ;;  %v1806_v16 = vmax.f32 %v1630_v12, 0.0  ;;  %v1561_v17 = vadd.f32 %v1560_v13, %v3173_v62  ;;  %v1632_v18 = vadd.f32 %v1631_v14, %v3176_v38 }
 0x3b1   :  { %v1564_v19 = vpop.f32.mrf.mxu0  ;;  %v1635_v20 = vpop.f32.mrf.mxu1  ;;  %v1215_v11 = vsub.s32 4, %v3158_v37  ;;  %v1223_v12 = vsub.s32 6, %v3158_v37 }
 0x3b2   :  { %1853 = vst [vmem:[#allocation10 + $0x38] sm:$0xff] %v1804_v15  ;;  %1855 = vst [vmem:[#allocation10 + $0x48] sm:$0xff] %v1806_v16  ;;  %v1805_v21 = vmax.f32 %v1561_v17, 0.0  ;;  %v1807_v22 = vmax.f32 %v1632_v18, 0.0  ;;  %v1565_v23 = vadd.f32 %v1564_v19, %v3167_v60  ;;  %v1636_v24 = vadd.f32 %v1635_v20, %v3170_v61 }
 0x3b3   :  { %v1566_v36 = vpop.f32.mrf.mxu0  ;;  %v1637_v25 = vpop.f32.mrf.mxu1  ;;  %v1219_v19 = vsub.s32 5, %v3158_v37 }
 0x3b4   :  { %1854 = vst [vmem:[#allocation10 + $0x40] sm:$0xff] %v1805_v21  ;;  %1856 = vst [vmem:[#allocation10 + $0x50] sm:$0xff] %v1807_v22  ;;  %v1811_v27 = vmax.f32 %v1565_v23, 0.0  ;;  %v1813_v40 = vmax.f32 %v1636_v24, 0.0  ;;  %v1567_v26 = vadd.f32 %v1566_v36, %v3173_v62  ;;  %v1638_v28 = vadd.f32 %v1637_v25, %v3176_v38 }
 0x3b5   :  { %v1568_v42 = vpop.f32.mrf.mxu0  ;;  %v1639_v43 = vpop.f32.mrf.mxu1 }
 0x3b6   :  { %1860 = vst [vmem:[#allocation10 + $0x70] sm:$0xff] %v1811_v27  ;;  %1862 = vst [vmem:[#allocation10 + $0x80] sm:$0xff] %v1813_v40  ;;  %v1812_v44 = vmax.f32 %v1567_v26, 0.0  ;;  %v1814_v45 = vmax.f32 %v1638_v28, 0.0  ;;  %v1569_v30 = vadd.f32 %v1568_v42, %v3167_v60  ;;  %v1640_v32 = vadd.f32 %v1639_v43, %v3170_v61 }
 0x3b7   :  { %v1570_v46 = vpop.f32.mrf.mxu0  ;;  %v1641_v47 = vpop.f32.mrf.mxu1  ;;  %v1224_v27 = vrot.slane %v3162_v57, %v1223_v12  ;;  %v3214_v26 = vrot.slane %v3162_v57, %v1219_v19 }
 0x3b8   :  { %1861 = vst [vmem:[#allocation10 + $0x78] sm:$0xff] %v1812_v44  ;;  %1863 = vst [vmem:[#allocation10 + $0x88] sm:$0xff] %v1814_v45  ;;  %v1818_v29 = vmax.f32 %v1569_v30, 0.0  ;;  %v1820_v31 = vmax.f32 %v1640_v32, 0.0  ;;  %v1571_v48 = vadd.f32 %v1570_v46, %v3173_v62  ;;  %v1642_v49 = vadd.f32 %v1641_v47, %v3176_v38 }
 0x3b9   :  { %v1574_v50 = vpop.f32.mrf.mxu0  ;;  %v1645_v51 = vpop.f32.mrf.mxu1 }
 0x3ba   :  { %1867 = vst [vmem:[#allocation10 + $0xa8] sm:$0xff] %v1818_v29  ;;  %1869 = vst [vmem:[#allocation10 + $0xb8] sm:$0xff] %v1820_v31  ;;  %v1819_v52 = vmax.f32 %v1571_v48, 0.0  ;;  %v1821_v53 = vmax.f32 %v1642_v49, 0.0  ;;  %v1575_v33 = vadd.f32 %v1574_v50, %v3167_v60  ;;  %v1646_v35 = vadd.f32 %v1645_v51, %v3170_v61 }
 0x3bb   :  { %v1576_v54 = vpop.f32.mrf.mxu0  ;;  %v1647_v34 = vpop.f32.mrf.mxu1 }
 0x3bc   :  { %1868 = vst [vmem:[#allocation10 + $0xb0] sm:$0xff] %v1819_v52  ;;  %1870 = vst [vmem:[#allocation10 + $0xc0] sm:$0xff] %v1821_v53  ;;  %v1825_v55 = vmax.f32 %v1575_v33, 0.0  ;;  %v1827_v56 = vmax.f32 %v1646_v35, 0.0  ;;  %v1577_v58 = vadd.f32 %v1576_v54, %v3173_v62  ;;  %v1648_v59 = vadd.f32 %v1647_v34, %v3176_v38 }
 0x3bd   :  { %v1578_v63 = vpop.f32.mrf.mxu0  ;;  %v1649_v39 = vpop.f32.mrf.mxu1 }
 0x3be   :  { %1874 = vst [vmem:[#allocation10 + $0xe0] sm:$0xff] %v1825_v55  ;;  %1876 = vst [vmem:[#allocation10 + $0xf0] sm:$0xff] %v1827_v56  ;;  %v1826_v41 = vmax.f32 %v1577_v58, 0.0  ;;  %v1828_v0 = vmax.f32 %v1648_v59, 0.0  ;;  %v1579_v1 = vadd.f32 %v1578_v63, %v3167_v60  ;;  %v1650_v2 = vadd.f32 %v1649_v39, %v3170_v61 }
 0x3bf   :  { %v1580_v3 = vpop.f32.mrf.mxu0  ;;  %v1651_v4 = vpop.f32.mrf.mxu1 }
 0x3c0   :  { %1875 = vst [vmem:[#allocation10 + $0xe8] sm:$0xff] %v1826_v41  ;;  %1877 = vst [vmem:[#allocation10 + $0xf8] sm:$0xff] %v1828_v0  ;;  %v1832_v5 = vmax.f32 %v1579_v1, 0.0  ;;  %v1834_v6 = vmax.f32 %v1650_v2, 0.0  ;;  %v1581_v7 = vadd.f32 %v1580_v3, %v3173_v62  ;;  %v1652_v8 = vadd.f32 %v1651_v4, %v3176_v38 }
 0x3c1   :  { %v1584_v9 = vpop.f32.mrf.mxu0  ;;  %v1655_v10 = vpop.f32.mrf.mxu1 }
 0x3c2   :  { %1881 = vst [vmem:[#allocation10 + $0x118] sm:$0xff] %v1832_v5  ;;  %1883 = vst [vmem:[#allocation10 + $0x128] sm:$0xff] %v1834_v6  ;;  %v1833_v13 = vmax.f32 %v1581_v7, 0.0  ;;  %v1835_v14 = vmax.f32 %v1652_v8, 0.0  ;;  %v1585_v15 = vadd.f32 %v1584_v9, %v3167_v60  ;;  %v1656_v16 = vadd.f32 %v1655_v10, %v3170_v61 }
 0x3c3   :  { %v1586_v17 = vpop.f32.mrf.mxu0  ;;  %v1657_v18 = vpop.f32.mrf.mxu1  ;;  %v3210_v61 = vrot.slane %v3162_v57, %v1215_v11 }
 0x3c4   :  { %1882 = vst [vmem:[#allocation10 + $0x120] sm:$0xff] %v1833_v13  ;;  %1884 = vst [vmem:[#allocation10 + $0x130] sm:$0xff] %v1835_v14  ;;  %v1839_v20 = vmax.f32 %v1585_v15, 0.0  ;;  %v1841_v21 = vmax.f32 %v1656_v16, 0.0  ;;  %v1587_v22 = vadd.f32 %v1586_v17, %v3173_v62  ;;  %v1658_v23 = vadd.f32 %v1657_v18, %v3176_v38 }
 0x3c5   :  { %v1588_v24 = vpop.f32.mrf.mxu0  ;;  %v1659_v36 = vpop.f32.mrf.mxu1 }
 0x3c6   :  { %1888 = vst [vmem:[#allocation10 + $0x150] sm:$0xff] %v1839_v20  ;;  %1890 = vst [vmem:[#allocation10 + $0x160] sm:$0xff] %v1841_v21  ;;  %v1840_v25 = vmax.f32 %v1587_v22, 0.0  ;;  %v1842_v60 = vmax.f32 %v1658_v23, 0.0 }
 0x3c7   :  { %v1589_v37 = vpop.f32.mrf.mxu0  ;;  %v1660_v40 = vpop.f32.mrf.mxu1 }
 0x3c8   :  { %1889 = vst [vmem:[#allocation10 + $0x158] sm:$0xff] %v1840_v25  ;;  %1891 = vst [vmem:[#allocation10 + $0x168] sm:$0xff] %v1842_v60 }
 0x3c9   :  { %v1696_v62 = vpop.f32.mrf.mxu0  ;;  %v2279_v38 = vpop.f32.mrf.mxu1 }
 0x3ca   :  { %v1697_v28 = vadd.f32 %v1696_v62, %v3210_v61  ;;  %v1776_v42 = vadd.f32 %v2279_v38, %v1224_v27 }
 0x3cb   :  { %v1698_v43 = vpop.f32.mrf.mxu0  ;;  %v1767_v44 = vpop.f32.mrf.mxu1 }
 0x3cc   :  { %v1801_v45 = vmax.f32 %v1697_v28, 0.0  ;;  %v1817_v30 = vmax.f32 %v1776_v42, 0.0  ;;  %v1699_v32 = vadd.f32 %v1698_v43, %v3214_v26  ;;  %v1768_v46 = vadd.f32 %v1767_v44, %v1224_v27 }
 0x3cd   :  { %v1700_v47 = vpop.f32.mrf.mxu0  ;;  %v2280_v29 = vpop.f32.mrf.mxu1 }
 0x3ce   :  { %1850 = vst [vmem:[#allocation10 + $0x20] sm:$0xff] %v1801_v45  ;;  %1866 = vst.msk [vmem:[#allocation10 + $0xa0] sm:$0xff] %vm559_vm0, %v1817_v30  ;;  %v1802_v31 = vmax.f32 %v1699_v32, 0.0  ;;  %v1803_v57 = vmax.f32 %v1768_v46, 0.0  ;;  %v1701_v48 = vadd.f32 %v1700_v47, %v3210_v61  ;;  %v1779_v49 = vadd.f32 %v2280_v29, %v1224_v27 }
 0x3cf   :  { %v1702_v50 = vpop.f32.mrf.mxu0  ;;  %v1770_v51 = vpop.f32.mrf.mxu1 }
 0x3d0   :  { %1851 = vst [vmem:[#allocation10 + $0x28] sm:$0xff] %v1802_v31  ;;  %1852 = vst.msk [vmem:[#allocation10 + $0x30] sm:$0xff] %vm559_vm0, %v1803_v57  ;;  %v1808_v52 = vmax.f32 %v1701_v48, 0.0  ;;  %v1824_v53 = vmax.f32 %v1779_v49, 0.0  ;;  %v1703_v33 = vadd.f32 %v1702_v50, %v3214_v26  ;;  %v1771_v35 = vadd.f32 %v1770_v51, %v1224_v27 }
 0x3d1   :  { %v1706_v54 = vpop.f32.mrf.mxu0  ;;  %v2283_v34 = vpop.f32.mrf.mxu1 }
 0x3d2   :  { %1857 = vst [vmem:[#allocation10 + $0x58] sm:$0xff] %v1808_v52  ;;  %1873 = vst.msk [vmem:[#allocation10 + $0xd8] sm:$0xff] %vm559_vm0, %v1824_v53  ;;  %v1809_v55 = vmax.f32 %v1703_v33, 0.0  ;;  %v1810_v56 = vmax.f32 %v1771_v35, 0.0  ;;  %v1707_v58 = vadd.f32 %v1706_v54, %v3210_v61  ;;  %v1792_v59 = vadd.f32 %v2283_v34, %v1224_v27 }
 0x3d3   :  { %v1708_v63 = vpop.f32.mrf.mxu0  ;;  %v1783_v39 = vpop.f32.mrf.mxu1 }
 0x3d4   :  { %1858 = vst [vmem:[#allocation10 + $0x60] sm:$0xff] %v1809_v55  ;;  %1859 = vst.msk [vmem:[#allocation10 + $0x68] sm:$0xff] %vm559_vm0, %v1810_v56  ;;  %v1815_v41 = vmax.f32 %v1707_v58, 0.0  ;;  %v1845_v0 = vmax.f32 %v1792_v59, 0.0  ;;  %v1709_v1 = vadd.f32 %v1708_v63, %v3214_v26  ;;  %v1784_v2 = vadd.f32 %v1783_v39, %v1224_v27 }
 0x3d5   :  { %v1710_v3 = vpop.f32.mrf.mxu0  ;;  %v2284_v4 = vpop.f32.mrf.mxu1 }
 0x3d6   :  { %1864 = vst [vmem:[#allocation10 + $0x90] sm:$0xff] %v1815_v41  ;;  %1894 = vst.msk [vmem:[#allocation10 + $0x180] sm:$0xff] %vm559_vm0, %v1845_v0  ;;  %v1816_v5 = vmax.f32 %v1709_v1, 0.0  ;;  %v1831_v6 = vmax.f32 %v1784_v2, 0.0  ;;  %v1711_v7 = vadd.f32 %v1710_v3, %v3210_v61 }
 0x3d7   :  { %v1712_v8 = vpop.f32.mrf.mxu0  ;;  %v1786_v9 = vpop.f32.mrf.mxu1 }
 0x3d8   :  { %1865 = vst [vmem:[#allocation10 + $0x98] sm:$0xff] %v1816_v5  ;;  %1880 = vst.msk [vmem:[#allocation10 + $0x110] sm:$0xff] %vm559_vm0, %v1831_v6  ;;  %v1822_v10 = vmax.f32 %v1711_v7, 0.0  ;;  %v1713_v11 = vadd.f32 %v1712_v8, %v3214_v26  ;;  %v1787_v12 = vadd.f32 %v1786_v9, %v1224_v27 }
 0x3d9   :  { %v1716_v13 = vpop.f32.mrf.mxu0 }
 0x3da   :  { %1871 = vst [vmem:[#allocation10 + $0xc8] sm:$0xff] %v1822_v10  ;;  %v1823_v14 = vmax.f32 %v1713_v11, 0.0  ;;  %v1838_v15 = vmax.f32 %v1787_v12, 0.0  ;;  %v1717_v16 = vadd.f32 %v1716_v13, %v3210_v61 }
 0x3db   :  { %v1718_v17 = vpop.f32.mrf.mxu0 }
 0x3dc   :  { %1872 = vst [vmem:[#allocation10 + $0xd0] sm:$0xff] %v1823_v14  ;;  %1887 = vst.msk [vmem:[#allocation10 + $0x148] sm:$0xff] %vm559_vm0, %v1838_v15  ;;  %v1829_v18 = vmax.f32 %v1717_v16, 0.0  ;;  %v1719_v19 = vadd.f32 %v1718_v17, %v3214_v26 }
 0x3dd   :  { %v1720_v20 = vpop.f32.mrf.mxu0 }
 0x3de   :  { %1878 = vst [vmem:[#allocation10 + $0x100] sm:$0xff] %v1829_v18  ;;  %v1830_v21 = vmax.f32 %v1719_v19, 0.0  ;;  %v1721_v22 = vadd.f32 %v1720_v20, %v3210_v61 }
 0x3df   :  { %v1722_v23 = vpop.f32.mrf.mxu0 }
 0x3e0   :  { %1879 = vst [vmem:[#allocation10 + $0x108] sm:$0xff] %v1830_v21  ;;  %v1836_v24 = vmax.f32 %v1721_v22, 0.0  ;;  %v1723_v36 = vadd.f32 %v1722_v23, %v3214_v26 }
 0x3e1   :  { %v1726_v25 = vpop.f32.mrf.mxu0 }
 0x3e2   :  { %1885 = vst [vmem:[#allocation10 + $0x138] sm:$0xff] %v1836_v24  ;;  %v1837_v60 = vmax.f32 %v1723_v36, 0.0  ;;  %v1727_v27 = vadd.f32 %v1726_v25, %v3210_v61 }
 0x3e3   :  { %v1728_v37 = vpop.f32.mrf.mxu0 }
 0x3e4   :  { %1886 = vst [vmem:[#allocation10 + $0x140] sm:$0xff] %v1837_v60  ;;  %v1843_v40 = vmax.f32 %v1727_v27, 0.0  ;;  %v1729_v62 = vadd.f32 %v1728_v37, %v3214_v26 }
 0x3e5   :  { %v1730_v38 = vpop.f32.mrf.mxu0 }
 0x3e6   :  { %1892 = vst [vmem:[#allocation10 + $0x170] sm:$0xff] %v1843_v40  ;;  %v1844_v28 = vmax.f32 %v1729_v62, 0.0 }
 0x3e7   :  { %v1731_v42 = vpop.f32.mrf.mxu0 }
 0x3e8   :  { %1893 = vst [vmem:[#allocation10 + $0x178] sm:$0xff] %v1844_v28 }
 0x3e9   :  { %2531 = shalt.err (!%p2528_p10)
}
 0x3ea   :  { %s2556_s17 = smov 896   ;;  %s2557_s18 = smov 56  }
 0x3eb   :  { %1906 = dma.vmem_to_hbm [thread:$0]  %s1901_s8, 6272, %s3249_s9, [#allocation4], %s2556_s17, %s2556_s17, %s2557_s18  }
 0x3ec   :  { %2546 = dma.done.wait [#allocation4], 6272  }
 0x3ed   :  { %2547 = vsyncadd [#allocation4], 4294961024 }
 0x3ee   :  { %1910 = vsyncpa [#allocation3], 1 }
 0x3ef   :  { %1911 = vsyncpa [#allocation6], 1 }
 0x3f0   :  { %1912 = vsyncpa [#allocation9], 1 }
 0x3f1   :  { %1913 = vsyncpa [#allocation4], 1 }

</bundles_post_ra>
